<compile_context>
chip_gen: v7x
topology: tpu7x:2x2x1
jax: 0.10.0
libtpu: 0.0.40
codegen_flags: <defaults>
</compile_context>

<pallas_src>
import jax
import jax.numpy as jnp
from jax import lax
from jax.experimental import pallas as pl
from jax.experimental.pallas import tpu as pltpu


def bottleneck_kernel(x_ref, w1_ref, b1_ref, w2_ref, b2_ref, w3_ref, b3_ref,
                      o_ref):
    Nb, H, W, C = x_ref.shape                   # x is bf16, C lane-padded
    P = w1_ref.shape[1]                         # planes, lane-padded
    M = Nb * H * W

    # ---- conv1 (1x1, BN1 scale pre-folded into w1) + bias + ReLU -------------
    x2 = x_ref[...].reshape(M, C)                                   # bf16, layout-preserving
    out1 = jnp.dot(x2, w1_ref[...], preferred_element_type=jnp.float32)
    out1 = jnp.maximum(out1 + b1_ref[...], 0.0).astype(jnp.bfloat16)   # (M, P) bf16

    # ---- conv2 (3x3, stride 1, pad 1, BN2 scale pre-folded) + bias + ReLU ----
    # Accumulated matmuls: one (M, 3P) bf16 slab per kernel row (K = 3P each),
    # f32 accumulation.  No (M, 9P) f32 im2col, no second cast pass.
    o1 = out1.reshape(Nb, H, W, P)
    zrow = jnp.zeros((Nb, 1, W, P), jnp.bfloat16)
    zcol = jnp.zeros((Nb, H, 1, P), jnp.bfloat16)

    def shift_h(a, dy):                         # tap[y] = a[y + dy], zero at border
        if dy == -1:
            return jnp.concatenate([zrow, a[:, :H - 1]], axis=1)
        if dy == 1:
            return jnp.concatenate([a[:, 1:], zrow], axis=1)
        return a

    def shift_w(a, dx):                         # tap[x] = a[x + dx], zero at border
        if dx == -1:
            return jnp.concatenate([zcol, a[:, :, :W - 1]], axis=2)
        if dx == 1:
            return jnp.concatenate([a[:, :, 1:], zcol], axis=2)
        return a

    acc = None
    for ky in range(3):
        hy = shift_h(o1, ky - 1)
        slab = jnp.concatenate([shift_w(hy, kx - 1) for kx in range(3)],
                               axis=3).reshape(M, 3 * P)            # (M, 3P) bf16
        wk = w2_ref[ky * 3 * P:(ky + 1) * 3 * P, :]                 # (3P, P) bf16
        part = jnp.dot(slab, wk, preferred_element_type=jnp.float32)
        acc = part if acc is None else acc + part
    out2 = jnp.maximum(acc + b2_ref[...], 0.0).astype(jnp.bfloat16)    # (M, P) bf16

    # ---- conv3 (1x1, BN3 scale pre-folded) + bias + residual + ReLU ----------
    out3 = jnp.dot(out2, w3_ref[...], preferred_element_type=jnp.float32)
    out3 = out3 + b3_ref[...]                                       # (M, C) f32
    res = x_ref[...].reshape(M, C).astype(jnp.float32)              # residual (in VMEM)
    y = jnp.maximum(out3 + res, 0.0)
    o_ref[...] = y.reshape(Nb, H, W, C).astype(o_ref.dtype)


def _per_image_vmem_bytes(H, W, Cpad, Ppad):
    """Rough per-image VMEM working set for the block-size heuristic."""
    rows = H * W
    io = rows * Cpad * (2 * 2 + 4 * 2)          # bf16 input + f32 output, both double-buffered
    inter = rows * (
        Ppad * 2            # out1 (bf16)
        + 3 * Ppad * 2      # one (M, 3P) bf16 slab live at a time
        + Ppad * 4          # conv2 f32 accumulator
        + Ppad * 2          # out2 (bf16)
        + Cpad * 4          # out3 (f32)
        + Cpad * 4          # residual upcast / epilogue (f32)
    )
    return io + inter


def bottleneck_pallas(x_nhwc, w1, b1, w2_hwio, b2, w3, b3, *, block_n=None):
    """x_nhwc f32; w1 (Cin,P), w2_hwio (3,3,P,P), w3 (P,Cout) — BN scales folded."""
    N, H, W, Cin = x_nhwc.shape
    P = w1.shape[1]
    Cout = w3.shape[1]
    assert Cin == Cout, "residual add requires inplanes == planes * expansion"

    LANES = 128
    Cpad = -(-Cin // LANES) * LANES
    Ppad = -(-P // LANES) * LANES

    # Lane-dense padding of both the channel axis (Cin/Cout) and planes (P).
    xp = x_nhwc if Cpad == Cin else jnp.pad(
        x_nhwc, ((0, 0), (0, 0), (0, 0), (0, Cpad - Cin)))
    xp = xp.astype(jnp.bfloat16)                # halve input DMA bytes; residual upcast in-kernel

    w1p = jnp.pad(w1, ((0, Cpad - Cin), (0, Ppad - P)))
    w2p = jnp.pad(w2_hwio, ((0, 0), (0, 0), (0, Ppad - P), (0, Ppad - P)))
    w3p = jnp.pad(w3, ((0, Ppad - P), (0, Cpad - Cout)))
    b1p = jnp.pad(b1, (0, Ppad - P))
    b2p = jnp.pad(b2, (0, Ppad - P))
    b3p = jnp.pad(b3, (0, Cpad - Cout))

    # MXU operands in bf16 (accumulation + elementwise epilogue stay f32).
    w1k = w1p.astype(jnp.bfloat16)                              # (Cpad, Ppad)
    w2k = w2p.reshape(9 * Ppad, Ppad).astype(jnp.bfloat16)      # rows = (ky, kx, ci)
    w3k = w3p.astype(jnp.bfloat16)                              # (Ppad, Cpad)
    b1k, b2k, b3k = b1p[None, :], b2p[None, :], b3p[None, :]    # (1, lanes) f32

    # Block size from an explicit VMEM budget (conservative for v7x's 64 MiB).
    if block_n is None:
        budget = 36 * 1024 * 1024
        per_img = _per_image_vmem_bytes(H, W, Cpad, Ppad)
        max_imgs = max(1, budget // per_img)
        divisors = [d for d in range(1, N + 1) if N % d == 0]
        fits = [d for d in divisors if d <= max_imgs]
        block_n = max(fits) if fits else 1
        # v7x megacore: ensure >=2 grid steps so the "parallel" axis shards across TCs.
        if N // block_n < 2 and N >= 2:
            halves = [d for d in divisors if d <= N // 2]
            if halves:
                block_n = max(halves)
    grid = (N // block_n,)

    def full_spec(a):
        nd = a.ndim
        return pl.BlockSpec(a.shape, lambda n, _nd=nd: (0,) * _nd)

    grid_spec = pltpu.PrefetchScalarGridSpec(
        num_scalar_prefetch=0,
        grid=grid,
        in_specs=[pl.BlockSpec((block_n, H, W, Cpad), lambda n: (n, 0, 0, 0))]
                + [full_spec(a) for a in (w1k, b1k, w2k, b2k, w3k, b3k)],
        out_specs=pl.BlockSpec((block_n, H, W, Cpad), lambda n: (n, 0, 0, 0)),
    )

    # Advisory cost estimate so XLA schedules surrounding ops around the call.
    flops = 2 * N * H * W * (Cpad * Ppad + 9 * Ppad * Ppad + Ppad * Cpad)
    bytes_accessed = (xp.size * 2 + N * H * W * Cpad * 4
                      + (w1k.size + w2k.size + w3k.size) * 2
                      + (b1k.size + b2k.size + b3k.size) * 4)
    cost = pl.CostEstimate(flops=flops, transcendentals=0,
                           bytes_accessed=bytes_accessed)

    out = pl.pallas_call(
        bottleneck_kernel,
        out_shape=jax.ShapeDtypeStruct((N, H, W, Cpad), x_nhwc.dtype),
        grid_spec=grid_spec,
        compiler_params=pltpu.CompilerParams(
            dimension_semantics=("parallel",),
            vmem_limit_bytes=48 * 1024 * 1024),
        cost_estimate=cost,
    )(xp, w1k, b1k, w2k, b2k, w3k, b3k)
    return out[..., :Cin] if Cpad != Cin else out


def make_bn_fold(key, c, eps=1e-5):
    k1, k2, k3, k4 = jax.random.split(key, 4)
    gamma = jax.random.uniform(k1, (c,), jnp.float32, 0.5, 1.5)
    beta = jax.random.normal(k2, (c,), jnp.float32) * 0.1
    mean = jax.random.normal(k3, (c,), jnp.float32) * 0.1
    var = jax.random.uniform(k4, (c,), jnp.float32, 0.5, 1.5)
    scale = gamma * lax.rsqrt(var + eps)
    bias = beta - mean * scale
    return scale, bias


if __name__ == "__main__":
    # Small shapes consistent with Bottleneck(inplanes=32, planes=8):
    # residual add requires inplanes == planes * expansion (4).
    N, inplanes, planes, H, W = 2, 32, 8, 8, 8
    cout = planes * 4  # == inplanes

    key = jax.random.PRNGKey(0)
    kx_, kw1, kw2, kw3, kb1, kb2, kb3 = jax.random.split(key, 7)

    # Input in PyTorch NCHW convention; weights in OIHW.
    x_nchw = jax.random.normal(kx_, (N, inplanes, H, W), jnp.float32)
    w1_oihw = jax.random.normal(kw1, (planes, inplanes, 1, 1), jnp.float32) * 0.1
    w2_oihw = jax.random.normal(kw2, (planes, planes, 3, 3), jnp.float32) * 0.1
    w3_oihw = jax.random.normal(kw3, (cout, planes, 1, 1), jnp.float32) * 0.1

    # Fold eval-mode BatchNorm into per-channel scale/bias.
    s1, b1 = make_bn_fold(kb1, planes)
    s2, b2 = make_bn_fold(kb2, planes)
    s3, b3 = make_bn_fold(kb3, cout)

    # Glue: layout conversion + folding BN scales into the conv weights.
    x_nhwc = jnp.transpose(x_nchw, (0, 2, 3, 1))                          # NHWC
    w1f = jnp.transpose(w1_oihw[:, :, 0, 0]) * s1[None, :]                # (Cin, P)
    w2f = jnp.transpose(w2_oihw, (2, 3, 1, 0)) * s2[None, None, None, :]  # (3,3,P,P) HWIO
    w3f = jnp.transpose(w3_oihw[:, :, 0, 0]) * s3[None, :]                # (P, Cout)

    out_nhwc = bottleneck_pallas(x_nhwc, w1f, b1, w2f, b2, w3f, b3)
    out_nhwc = jax.block_until_ready(out_nhwc)
    out_nchw = jnp.transpose(out_nhwc, (0, 3, 1, 2))

    # Pure-JAX reference mirroring the kernel's dtype handling
    # (bf16 input + MXU operands, f32 accumulation and elementwise epilogue).
    bf = jnp.bfloat16
    xb = x_nhwc.astype(bf)

    def ref_forward():
        o = jnp.einsum('nhwc,cp->nhwp', xb, w1f.astype(bf),
                       preferred_element_type=jnp.float32)
        o = jnp.maximum(o + b1, 0.0).astype(bf)
        o = lax.conv_general_dilated(o, w2f.astype(bf), (1, 1),
                                     ((1, 1), (1, 1)),
                                     dimension_numbers=('NHWC', 'HWIO', 'NHWC'),
                                     preferred_element_type=jnp.float32)
        o = jnp.maximum(o + b2, 0.0).astype(bf)
        o = jnp.einsum('nhwp,pc->nhwc', o, w3f.astype(bf),
                       preferred_element_type=jnp.float32)
        o = o + b3
        return jnp.maximum(o + xb.astype(jnp.float32), 0.0)

    ref = jax.block_until_ready(ref_forward())
    assert out_nhwc.shape == (N, H, W, inplanes)
    err = float(jnp.max(jnp.abs(out_nhwc - ref)))
    assert jnp.allclose(out_nhwc, ref, atol=1e-3, rtol=1e-3), err

    print("KERNEL_OK")
</pallas_src>

<mosaic_0001>
module attributes {stable_mosaic.version = 11 : i64} {
  func.func @bottleneck_kernel(%arg0: i32, %arg1: memref<1x8x8x128xbf16, #tpu.memory_space<vmem>>, %arg2: memref<128x128xbf16, #tpu.memory_space<vmem>>, %arg3: memref<1x128xf32, #tpu.memory_space<vmem>>, %arg4: memref<1152x128xbf16, #tpu.memory_space<vmem>>, %arg5: memref<1x128xf32, #tpu.memory_space<vmem>>, %arg6: memref<128x128xbf16, #tpu.memory_space<vmem>>, %arg7: memref<1x128xf32, #tpu.memory_space<vmem>>, %arg8: memref<1x8x8x128xf32, #tpu.memory_space<vmem>>) attributes {dimension_semantics = [#tpu.dimension_semantics<parallel>], iteration_bounds = array<i64: 2>, scalar_prefetch = 0 : i64, scratch_operands = 0 : i64, tpu.core_type = #tpu.core_type<tc>, window_params = [{transform_indices = @transform_0, window_bounds = array<i64: 1, 8, 8, 128>}, {pipeline_mode = #tpu.pipeline_mode<synchronous>, transform_indices = @transform_1, window_bounds = array<i64: 128, 128>}, {pipeline_mode = #tpu.pipeline_mode<synchronous>, transform_indices = @transform_2, window_bounds = array<i64: 1, 128>}, {pipeline_mode = #tpu.pipeline_mode<synchronous>, transform_indices = @transform_3, window_bounds = array<i64: 1152, 128>}, {pipeline_mode = #tpu.pipeline_mode<synchronous>, transform_indices = @transform_4, window_bounds = array<i64: 1, 128>}, {pipeline_mode = #tpu.pipeline_mode<synchronous>, transform_indices = @transform_5, window_bounds = array<i64: 128, 128>}, {pipeline_mode = #tpu.pipeline_mode<synchronous>, transform_indices = @transform_6, window_bounds = array<i64: 1, 128>}, {transform_indices = @transform_7, window_bounds = array<i64: 1, 8, 8, 128>}]} {
    %c0 = arith.constant 0 : index
    %c0_0 = arith.constant 0 : index
    %c0_1 = arith.constant 0 : index
    %c0_2 = arith.constant 0 : index
    %0 = vector.load %arg1[%c0, %c0_0, %c0_1, %c0_2] : memref<1x8x8x128xbf16, #tpu.memory_space<vmem>>, vector<1x8x8x128xbf16>
    %1 = vector.shape_cast %0 : vector<1x8x8x128xbf16> to vector<64x128xbf16>
    %c0_3 = arith.constant 0 : index
    %c0_4 = arith.constant 0 : index
    %2 = vector.load %arg2[%c0_3, %c0_4] : memref<128x128xbf16, #tpu.memory_space<vmem>>, vector<128x128xbf16>
    %cst = arith.constant dense<0.000000e+00> : vector<64x128xf32>
    %3 = tpu.matmul %1, %2, %cst {dimension_numbers = #tpu.dot_dimension_numbers<[1], [0], [0], [1], [0, 0, 1, 1], [], []>} : vector<64x128xbf16>, vector<128x128xbf16>, vector<64x128xf32> -> vector<64x128xf32>
    %c0_5 = arith.constant 0 : index
    %c0_6 = arith.constant 0 : index
    %4 = vector.load %arg3[%c0_5, %c0_6] : memref<1x128xf32, #tpu.memory_space<vmem>>, vector<1x128xf32>
    %5 = vector.broadcast %4 : vector<1x128xf32> to vector<64x128xf32>
    %6 = arith.addf %3, %5 : vector<64x128xf32>
    %cst_7 = arith.constant 0.000000e+00 : f32
    %7 = vector.broadcast %cst_7 : f32 to vector<64x128xf32>
    %8 = arith.maximumf %6, %7 : vector<64x128xf32>
    %9 = arith.truncf %8 : vector<64x128xf32> to vector<64x128xbf16>
    %10 = vector.shape_cast %9 : vector<64x128xbf16> to vector<1x8x8x128xbf16>
    %cst_8 = arith.constant 0.000000e+00 : bf16
    %11 = vector.broadcast %cst_8 : bf16 to vector<1x1x8x128xbf16>
    %cst_9 = arith.constant 0.000000e+00 : bf16
    %12 = vector.broadcast %cst_9 : bf16 to vector<1x8x1x128xbf16>
    %13 = vector.extract_strided_slice %10 {offsets = [0, 0, 0, 0], sizes = [1, 7, 8, 128], strides = [1, 1, 1, 1]} : vector<1x8x8x128xbf16> to vector<1x7x8x128xbf16>
    %14 = tpu.concatenate %11, %13 in 1 : vector<1x1x8x128xbf16>, vector<1x7x8x128xbf16> -> vector<1x8x8x128xbf16>
    %15 = vector.extract_strided_slice %14 {offsets = [0, 0, 0, 0], sizes = [1, 8, 7, 128], strides = [1, 1, 1, 1]} : vector<1x8x8x128xbf16> to vector<1x8x7x128xbf16>
    %16 = tpu.concatenate %12, %15 in 2 : vector<1x8x1x128xbf16>, vector<1x8x7x128xbf16> -> vector<1x8x8x128xbf16>
    %17 = vector.extract_strided_slice %14 {offsets = [0, 0, 1, 0], sizes = [1, 8, 7, 128], strides = [1, 1, 1, 1]} : vector<1x8x8x128xbf16> to vector<1x8x7x128xbf16>
    %18 = tpu.concatenate %17, %12 in 2 : vector<1x8x7x128xbf16>, vector<1x8x1x128xbf16> -> vector<1x8x8x128xbf16>
    %19 = tpu.concatenate %16, %14, %18 in 3 : vector<1x8x8x128xbf16>, vector<1x8x8x128xbf16>, vector<1x8x8x128xbf16> -> vector<1x8x8x384xbf16>
    %20 = vector.shape_cast %19 : vector<1x8x8x384xbf16> to vector<64x384xbf16>
    %c0_10 = arith.constant 0 : index
    %c0_11 = arith.constant 0 : index
    %21 = vector.load %arg4[%c0_10, %c0_11] : memref<1152x128xbf16, #tpu.memory_space<vmem>>, vector<384x128xbf16>
    %cst_12 = arith.constant dense<0.000000e+00> : vector<64x128xf32>
    %22 = tpu.matmul %20, %21, %cst_12 {dimension_numbers = #tpu.dot_dimension_numbers<[1], [0], [0], [1], [0, 0, 1, 1], [], []>} : vector<64x384xbf16>, vector<384x128xbf16>, vector<64x128xf32> -> vector<64x128xf32>
    %23 = vector.extract_strided_slice %10 {offsets = [0, 0, 0, 0], sizes = [1, 8, 7, 128], strides = [1, 1, 1, 1]} : vector<1x8x8x128xbf16> to vector<1x8x7x128xbf16>
    %24 = tpu.concatenate %12, %23 in 2 : vector<1x8x1x128xbf16>, vector<1x8x7x128xbf16> -> vector<1x8x8x128xbf16>
    %25 = vector.extract_strided_slice %10 {offsets = [0, 0, 1, 0], sizes = [1, 8, 7, 128], strides = [1, 1, 1, 1]} : vector<1x8x8x128xbf16> to vector<1x8x7x128xbf16>
    %26 = tpu.concatenate %25, %12 in 2 : vector<1x8x7x128xbf16>, vector<1x8x1x128xbf16> -> vector<1x8x8x128xbf16>
    %27 = tpu.concatenate %24, %10, %26 in 3 : vector<1x8x8x128xbf16>, vector<1x8x8x128xbf16>, vector<1x8x8x128xbf16> -> vector<1x8x8x384xbf16>
    %28 = vector.shape_cast %27 : vector<1x8x8x384xbf16> to vector<64x384xbf16>
    %c384 = arith.constant 384 : index
    %c0_13 = arith.constant 0 : index
    %29 = vector.load %arg4[%c384, %c0_13] : memref<1152x128xbf16, #tpu.memory_space<vmem>>, vector<384x128xbf16>
    %cst_14 = arith.constant dense<0.000000e+00> : vector<64x128xf32>
    %30 = tpu.matmul %28, %29, %cst_14 {dimension_numbers = #tpu.dot_dimension_numbers<[1], [0], [0], [1], [0, 0, 1, 1], [], []>} : vector<64x384xbf16>, vector<384x128xbf16>, vector<64x128xf32> -> vector<64x128xf32>
    %31 = arith.addf %22, %30 : vector<64x128xf32>
    %32 = vector.extract_strided_slice %10 {offsets = [0, 1, 0, 0], sizes = [1, 7, 8, 128], strides = [1, 1, 1, 1]} : vector<1x8x8x128xbf16> to vector<1x7x8x128xbf16>
    %33 = tpu.concatenate %32, %11 in 1 : vector<1x7x8x128xbf16>, vector<1x1x8x128xbf16> -> vector<1x8x8x128xbf16>
    %34 = vector.extract_strided_slice %33 {offsets = [0, 0, 0, 0], sizes = [1, 8, 7, 128], strides = [1, 1, 1, 1]} : vector<1x8x8x128xbf16> to vector<1x8x7x128xbf16>
    %35 = tpu.concatenate %12, %34 in 2 : vector<1x8x1x128xbf16>, vector<1x8x7x128xbf16> -> vector<1x8x8x128xbf16>
    %36 = vector.extract_strided_slice %33 {offsets = [0, 0, 1, 0], sizes = [1, 8, 7, 128], strides = [1, 1, 1, 1]} : vector<1x8x8x128xbf16> to vector<1x8x7x128xbf16>
    %37 = tpu.concatenate %36, %12 in 2 : vector<1x8x7x128xbf16>, vector<1x8x1x128xbf16> -> vector<1x8x8x128xbf16>
    %38 = tpu.concatenate %35, %33, %37 in 3 : vector<1x8x8x128xbf16>, vector<1x8x8x128xbf16>, vector<1x8x8x128xbf16> -> vector<1x8x8x384xbf16>
    %39 = vector.shape_cast %38 : vector<1x8x8x384xbf16> to vector<64x384xbf16>
    %c768 = arith.constant 768 : index
    %c0_15 = arith.constant 0 : index
    %40 = vector.load %arg4[%c768, %c0_15] : memref<1152x128xbf16, #tpu.memory_space<vmem>>, vector<384x128xbf16>
    %cst_16 = arith.constant dense<0.000000e+00> : vector<64x128xf32>
    %41 = tpu.matmul %39, %40, %cst_16 {dimension_numbers = #tpu.dot_dimension_numbers<[1], [0], [0], [1], [0, 0, 1, 1], [], []>} : vector<64x384xbf16>, vector<384x128xbf16>, vector<64x128xf32> -> vector<64x128xf32>
    %42 = arith.addf %31, %41 : vector<64x128xf32>
    %c0_17 = arith.constant 0 : index
    %c0_18 = arith.constant 0 : index
    %43 = vector.load %arg5[%c0_17, %c0_18] : memref<1x128xf32, #tpu.memory_space<vmem>>, vector<1x128xf32>
    %44 = vector.broadcast %43 : vector<1x128xf32> to vector<64x128xf32>
    %45 = arith.addf %42, %44 : vector<64x128xf32>
    %cst_19 = arith.constant 0.000000e+00 : f32
    %46 = vector.broadcast %cst_19 : f32 to vector<64x128xf32>
    %47 = arith.maximumf %45, %46 : vector<64x128xf32>
    %48 = arith.truncf %47 : vector<64x128xf32> to vector<64x128xbf16>
    %c0_20 = arith.constant 0 : index
    %c0_21 = arith.constant 0 : index
    %49 = vector.load %arg6[%c0_20, %c0_21] : memref<128x128xbf16, #tpu.memory_space<vmem>>, vector<128x128xbf16>
    %cst_22 = arith.constant dense<0.000000e+00> : vector<64x128xf32>
    %50 = tpu.matmul %48, %49, %cst_22 {dimension_numbers = #tpu.dot_dimension_numbers<[1], [0], [0], [1], [0, 0, 1, 1], [], []>} : vector<64x128xbf16>, vector<128x128xbf16>, vector<64x128xf32> -> vector<64x128xf32>
    %c0_23 = arith.constant 0 : index
    %c0_24 = arith.constant 0 : index
    %51 = vector.load %arg7[%c0_23, %c0_24] : memref<1x128xf32, #tpu.memory_space<vmem>>, vector<1x128xf32>
    %52 = vector.broadcast %51 : vector<1x128xf32> to vector<64x128xf32>
    %53 = arith.addf %50, %52 : vector<64x128xf32>
    %c0_25 = arith.constant 0 : index
    %c0_26 = arith.constant 0 : index
    %c0_27 = arith.constant 0 : index
    %c0_28 = arith.constant 0 : index
    %54 = vector.load %arg1[%c0_25, %c0_26, %c0_27, %c0_28] : memref<1x8x8x128xbf16, #tpu.memory_space<vmem>>, vector<1x8x8x128xbf16>
    %55 = vector.shape_cast %54 : vector<1x8x8x128xbf16> to vector<64x128xbf16>
    %56 = arith.extf %55 : vector<64x128xbf16> to vector<64x128xf32>
    %57 = arith.addf %53, %56 : vector<64x128xf32>
    %cst_29 = arith.constant 0.000000e+00 : f32
    %58 = vector.broadcast %cst_29 : f32 to vector<64x128xf32>
    %59 = arith.maximumf %57, %58 : vector<64x128xf32>
    %60 = vector.shape_cast %59 : vector<64x128xf32> to vector<1x8x8x128xf32>
    %c0_30 = arith.constant 0 : index
    %c0_31 = arith.constant 0 : index
    %c0_32 = arith.constant 0 : index
    %c0_33 = arith.constant 0 : index
    %61 = vector.load %arg8[%c0_30, %c0_31, %c0_32, %c0_33] : memref<1x8x8x128xf32, #tpu.memory_space<vmem>>, vector<1x8x8x128xf32>
    tpu.vector_store %arg8[%c0_30, %c0_31, %c0_32, %c0_33], %60 {strides = array<i32>} : memref<1x8x8x128xf32, #tpu.memory_space<vmem>>, vector<1x8x8x128xf32>,
    return
  }
  func.func @transform_0(%arg0: i32) -> (i32, i32, i32, i32) {
    %c0_i32 = arith.constant 0 : i32
    %c0_i32_0 = arith.constant 0 : i32
    %c0_i32_1 = arith.constant 0 : i32
    %c0_i32_2 = arith.constant 0 : i32
    return %arg0, %c0_i32, %c0_i32_0, %c0_i32_1 : i32, i32, i32, i32
  }
  func.func @transform_1(%arg0: i32) -> (i32, i32) {
    %c0_i32 = arith.constant 0 : i32
    %c0_i32_0 = arith.constant 0 : i32
    %c0_i32_1 = arith.constant 0 : i32
    return %c0_i32, %c0_i32_0 : i32, i32
  }
  func.func @transform_2(%arg0: i32) -> (i32, i32) {
    %c0_i32 = arith.constant 0 : i32
    %c0_i32_0 = arith.constant 0 : i32
    %c0_i32_1 = arith.constant 0 : i32
    return %c0_i32, %c0_i32_0 : i32, i32
  }
  func.func @transform_3(%arg0: i32) -> (i32, i32) {
    %c0_i32 = arith.constant 0 : i32
    %c0_i32_0 = arith.constant 0 : i32
    %c0_i32_1 = arith.constant 0 : i32
    return %c0_i32, %c0_i32_0 : i32, i32
  }
  func.func @transform_4(%arg0: i32) -> (i32, i32) {
    %c0_i32 = arith.constant 0 : i32
    %c0_i32_0 = arith.constant 0 : i32
    %c0_i32_1 = arith.constant 0 : i32
    return %c0_i32, %c0_i32_0 : i32, i32
  }
  func.func @transform_5(%arg0: i32) -> (i32, i32) {
    %c0_i32 = arith.constant 0 : i32
    %c0_i32_0 = arith.constant 0 : i32
    %c0_i32_1 = arith.constant 0 : i32
    return %c0_i32, %c0_i32_0 : i32, i32
  }
  func.func @transform_6(%arg0: i32) -> (i32, i32) {
    %c0_i32 = arith.constant 0 : i32
    %c0_i32_0 = arith.constant 0 : i32
    %c0_i32_1 = arith.constant 0 : i32
    return %c0_i32, %c0_i32_0 : i32, i32
  }
  func.func @transform_7(%arg0: i32) -> (i32, i32, i32, i32) {
    %c0_i32 = arith.constant 0 : i32
    %c0_i32_0 = arith.constant 0 : i32
    %c0_i32_1 = arith.constant 0 : i32
    %c0_i32_2 = arith.constant 0 : i32
    return %arg0, %c0_i32, %c0_i32_0, %c0_i32_1 : i32, i32, i32, i32
  }
}

</mosaic_0001>

<bundles_post_ra>
// kernel: tpu_custom_call.1
= control target key start
LH: loop header
LB: loop body
LE: loop exit
PB: predicated region body
PF: predicated region fallthrough
CT: control target
= control target key end

     0   :  { %12 = vsyncpa [#allocation3], 0  ;;  %s3452_s0 = inlined_call_operand.hbm [shape: bf16[2,8,8,128], index: 0, kind: input, shape index: {}]   ;;  %s3453_s1 = inlined_call_operand.hbm [shape: bf16[128,128], index: 1, kind: input, shape index: {}]   ;;  %s3454_s2 = inlined_call_operand.vmem [shape: f32[1,128], index: 2, kind: input, shape index: {}]   ;;  %s3455_s3 = inlined_call_operand.hbm [shape: bf16[1152,128], index: 3, kind: input, shape index: {}]   ;;  %s3456_s4 = inlined_call_operand.vmem [shape: f32[1,128], index: 4, kind: input, shape index: {}]   ;;  %s3457_s5 = inlined_call_operand.hbm [shape: bf16[128,128], index: 5, kind: input, shape index: {}]   ;;  %s3458_s6 = inlined_call_operand.vmem [shape: f32[1,128], index: 6, kind: input, shape index: {}]   ;;  %s3459_s7 = inlined_call_operand.hbm [shape: f32[2,8,8,128], index: 7, kind: output, shape index: {}]  }
   0x1   :  { %14 = vsyncpa [#allocation3 + $0x1], 0 }
   0x2   :  { %15 = vsyncpa [#allocation6], 0 }
   0x3   :  { %16 = vsyncpa [#allocation9], 0 }
   0x4   :  { %17 = vsyncpa [#allocation4], 0 }
   0x5   :  { %19 = vsyncpa [#allocation4 + $0x1], 0  ;;  %s2975_s24 = smov 0   ;;  %s2977_s25 = smov 0  }
   0x6   :  { %s2979_s26 = smov 0   ;;  %s2981_s27 = smov 0  }
   0x7 LB: > { %s2996_s28 = sadd.s32 4294967295, %s2923_s27   ;;  %s2060_s29 = sadd.s32 4294967294, %s2923_s27   ;;  %s2923_s27 = sphi %s2981_s27, %s3489_s27   ;;  %s2919_s26 = sphi %s2979_s26, %s3488_s26   ;;  %s2915_s25 = sphi %s2977_s25, %s3487_s25   ;;  %s2911_s24 = sphi %s2975_s24, %s3486_s24  }
   0x8   : > { %p45_p0 = scmp.ne.s32.totalorder %s2915_s25, %s2911_s24  ;;  %p3460_p1 = scmp.eq.s32.totalorder %s2996_s28, 0 }
   0x9   : > { %p201_p3 = scmp.eq.s32.totalorder %s2060_s29, 1  ;;  %p2061_p5 = scmp.ge.s32.totalorder %s2923_s27, 1 }
   0xa   : > { %p3005_p4 = por %p3460_p1, %p45_p0  ;;  %p208_p7 = scmp.lt.s32.totalorder %s2923_s27, 3 }
   0xb   : > { %p3010_p6 = por %p201_p3, %p45_p0  ;;  %s2925_s10 = smov [#allocation5]  }
   0xc   : > { %s3464_s30 = scalar_select %p3005_p4, 1, 0 }
   0xd   : > { %s3465_s8 = scalar_select %p3010_p6, 1, 0 }
   0xe   : > { %p3015_p8 = pnand %p2061_p5, %p208_p7  ;;  %s220_s11 = sshll.u32 %s2925_s10, 4  ;;  %s3019_s11 = int_to_ptr.vmem [resolvable:$true] %s220_s11 }
   0xf   : > { %3466 = sst [smem:[#allocation15_spill]] %s3465_s8  ;;  %s2926_s13 = smov [#allocation7]  }
  0x10   : > { %s3467_s9 = scalar_select %p3015_p8, 1, 0 }
  0x11   : > { %p2569_p9 = pneg %p3015_p8  ;;  %s236_s14 = sshll.u32 %s2926_s13, 4  ;;  %s3030_s14 = int_to_ptr.vmem [resolvable:$true] %s236_s14 }
  0x12   : > { %s2927_s15 = smov [#allocation8]   ;;  %s2735_s19 = scalar_lea.hbm %s3453_s1, 1024 }
  0x13   : > { %p3026_p11 = pnand %p2569_p9, %p3460_p1  ;;  %s3032_s16 = sshll.u32 %s2927_s15, 4  ;;  %s253_s16 = int_to_ptr.vmem [resolvable:$true] %s3032_s16 }
  0x14   : > { %p2736_p12 = scmp.ne.s32.totalorder %s3453_s1, %s2735_s19  ;;  %p2742_p5 = scmp.lt.u32.totalorder %s2735_s19, %s3453_s1 }
  0x15   : > { %p3042_p13 = pneg %p3026_p11 }
  0x17   : > { %p2738_p0 = pnand %p3042_p13, %p2736_p12 }
  0x19   : > { %p2739_p3 = pneg %p2738_p0 }
  0x1b   : > { %p2744_p7 = pnand %p2742_p5, %p2739_p3 }
  0x1d   : > { %2747 = shalt.err (!%p2744_p7)
}
  0x1e   : > { %s2748_s10 = scalar_lea.vmem %s3019_s11, 1024  ;;  %p2756_p2 = scmp.lt.s32.totalorder %s3019_s11, %s3019_s11 }
  0x1f   : > { %p2749_p9 = scmp.ne.s32.totalorder %s3019_s11, %s2748_s10  ;;  %p2757_p6 = scmp.lt.s32.totalorder %s2748_s10, %s2748_s10 }
  0x21   : > { %p2751_p10 = pnand %p2749_p9, %p3042_p13  ;;  %p2758_p12 = por %p2757_p6, %p2756_p2 }
  0x23   : > { %p2752_p1 = pneg %p2751_p10 }
  0x25   : > { %p2759_p0 = pnand %p2758_p12, %p2752_p1 }
  0x27   : > { %2762 = shalt.err (!%p2759_p0)
}
  0x28   : > { %s2928_s13 = smov 64   ;;  %s2929_s15 = smov 4  }
  0x29   : > { %2572 = dma.hbm_to_vmem [thread:$0]  (!%p3026_p11), %s3453_s1, 1024, %s3019_s11, [#allocation6], %s2928_s13, %s2928_s13, %s2929_s15  }
  0x2a   : > { %s2763_s21 = scalar_lea.hbm %s3455_s3, 9216 }
  0x2b   : > { %p2764_p1 = scmp.ne.s32.totalorder %s3455_s3, %s2763_s21  ;;  %p2770_p10 = scmp.lt.u32.totalorder %s2763_s21, %s3455_s3 }
  0x2d   : > { %p2766_p2 = pnand %p2764_p1, %p3042_p13 }
  0x2f   : > { %p2767_p6 = pneg %p2766_p2 }
  0x31   : > { %p2772_p3 = pnand %p2770_p10, %p2767_p6 }
  0x33   : > { %2775 = shalt.err (!%p2772_p3)
}
  0x34   : > { %s2776_s11 = scalar_lea.vmem %s3030_s14, 9216  ;;  %p2784_p12 = scmp.lt.s32.totalorder %s3030_s14, %s3030_s14 }
  0x35   : > { %p2777_p5 = scmp.ne.s32.totalorder %s3030_s14, %s2776_s11  ;;  %p2785_p0 = scmp.lt.s32.totalorder %s2776_s11, %s2776_s11 }
  0x37   : > { %p2779_p7 = pnand %p2777_p5, %p3042_p13  ;;  %p2786_p1 = por %p2785_p0, %p2784_p12 }
  0x39   : > { %p2780_p9 = pneg %p2779_p7 }
  0x3b   : > { %p2787_p2 = pnand %p2786_p1, %p2780_p9 }
  0x3d   : > { %2790 = shalt.err (!%p2787_p2)
}
  0x3e   : > { %2575 = dma.hbm_to_vmem [thread:$0]  (!%p3026_p11), %s3455_s3, 9216, %s3030_s14, [#allocation6], %s2928_s13, %s2928_s13, %s2929_s15  }
  0x3f   : > { %s2791_s20 = scalar_lea.hbm %s3457_s5, 1024 }
  0x40   : > { %p2792_p6 = scmp.ne.s32.totalorder %s3457_s5, %s2791_s20  ;;  %p2798_p5 = scmp.lt.u32.totalorder %s2791_s20, %s3457_s5 }
  0x42   : > { %p2794_p10 = pnand %p2792_p6, %p3042_p13 }
  0x44   : > { %p2795_p3 = pneg %p2794_p10 }
  0x46   : > { %p2800_p7 = pnand %p2798_p5, %p2795_p3 }
  0x48   : > { %2803 = shalt.err (!%p2800_p7)
}
  0x49   : > { %s2804_s11 = scalar_lea.vmem %s253_s16, 1024  ;;  %p2812_p1 = scmp.lt.s32.totalorder %s253_s16, %s253_s16 }
  0x4a   : > { %p2805_p9 = scmp.ne.s32.totalorder %s253_s16, %s2804_s11  ;;  %p2813_p2 = scmp.lt.s32.totalorder %s2804_s11, %s2804_s11 }
  0x4c   : > { %p2807_p12 = pnand %p2805_p9, %p3042_p13  ;;  %p2814_p4 = por %p2813_p2, %p2812_p1 }
  0x4e   : > { %p2808_p0 = pneg %p2807_p12 }
  0x50   : > { %p2815_p8 = pnand %p2814_p4, %p2808_p0 }
  0x52   : > { %2818 = shalt.err (!%p2815_p8)
}
  0x53   : > { %2578 = dma.hbm_to_vmem [thread:$0]  (!%p3026_p11), %s3457_s5, 1024, %s253_s16, [#allocation9], %s2928_s13, %s2928_s13, %s2929_s15  }
  0x54   : > { %s3115_s22 = sadd.s32 1, %s2923_s27   ;;  %s32_s17 = sadd.s32 1, %s2919_s26 }
  0x55   : > { %s29_s12 = ssub.s32 %s2923_s27, %s3115_s22  ;;  %p39_p8 = scmp.ne.s32.totalorder %s2919_s26, %s2915_s25 }
  0x56   : > { %p30_p4 = scmp.eq.s32.totalorder %s29_s12, 0  ;;  %p40_p13 = scmp.eq.s32.totalorder %s2923_s27, 0 }
  0x57   : > { %p2590_p6 = scmp.lt.s32.totalorder %s2923_s27, 2  ;;  %p3470_p3 = scmp.eq.s32.totalorder %s2996_s28, 1 }
  0x58   : > { %s3125_s18 = scalar_select %p30_p4, %s2919_s26, %s32_s17  }
  0x59   : > { %p41_p10 = por %p40_p13, %p39_p8  ;;  %p3129_p5 = por %p3470_p3, %p39_p8 }
  0x5a   : > { %s269_s20 = sand.u32 1, %s2919_s26   ;;  %s2203_s21 = sshll.u32 %s2923_s27, 9 }
  0x5b   : > { %s2066_s16 = sshll.u32 %s269_s20, 5  ;;  %s3138_s10 = scalar_lea.hbm %s3452_s0, %s2203_s21 }
  0x5c   : > { %s273_s11 = scalar_lea.vmem [#allocation2], %s2066_s16  ;;  %p3140_p11 = pnand %p2590_p6, %p41_p10 }
  0x5d   : > { %s280_s14 = sshll.u32 %s273_s11, 4  ;;  %s3146_s12 = scalar_lea.sflag [#allocation3], %s269_s20  ;;  %s3144_s14 = int_to_ptr.vmem [resolvable:$true] %s280_s14 }
  0x5e   : > { %s2819_s17 = scalar_lea.hbm %s3138_s10, 512  ;;  %p2821_p9 = pneg %p3140_p11 }
  0x5f   : > { %p2820_p7 = scmp.ne.s32.totalorder %s3138_s10, %s2819_s17  ;;  %s2824_s23 = scalar_lea.hbm %s3452_s0, 1024 }
  0x60   : > { %p2825_p1 = scmp.lt.u32.totalorder %s3138_s10, %s3452_s0  ;;  %p2826_p2 = scmp.lt.u32.totalorder %s2824_s23, %s2819_s17 }
  0x61   : > { %p2822_p12 = pnand %p2821_p9, %p2820_p7  ;;  %p2828_p8 = scmp.lt.u32.totalorder %s2819_s17, %s3138_s10 }
  0x62   : > { %p2827_p4 = por %p2826_p2, %p2825_p1 }
  0x63   : > { %p2823_p0 = pneg %p2822_p12 }
  0x64   : > { %p2829_p13 = por %p2828_p8, %p2827_p4 }
  0x66   : > { %p2830_p6 = pnand %p2829_p13, %p2823_p0 }
  0x68   : > { %2833 = shalt.err (!%p2830_p6)
}
  0x69   : > { %s2834_s20 = scalar_lea.vmem %s3144_s14, 512  ;;  %s2930_s21 = smov [#allocation2]  }
  0x6a   : > { %p2835_p10 = scmp.ne.s32.totalorder %s3144_s14, %s2834_s20  ;;  %s2839_s16 = sshll.u32 %s2930_s21, 4  ;;  %s2840_s16 = int_to_ptr.vmem [resolvable:$false] %s2839_s16 }
  0x6b   : > { %s2841_s29 = scalar_lea.vmem %s2840_s16, 1024  ;;  %p2842_p12 = scmp.lt.s32.totalorder %s3144_s14, %s2840_s16 }
  0x6c   : > { %p2837_p3 = pnand %p2835_p10, %p2821_p9  ;;  %p2843_p1 = scmp.lt.s32.totalorder %s2841_s29, %s2834_s20 }
  0x6e   : > { %p2838_p7 = pneg %p2837_p3  ;;  %p2844_p2 = por %p2843_p1, %p2842_p12 }
  0x70   : > { %p2845_p4 = pnand %p2844_p2, %p2838_p7 }
  0x72   : > { %2848 = shalt.err (!%p2845_p4)
}
  0x73   : > { %2582 = dma.hbm_to_vmem [thread:$0]  (!%p3140_p11), %s3138_s10, 512, %s3144_s14, %s3146_s12, %s2928_s13, %s2928_s13, %s2929_s15  }
  0x74   : > { %p3473_p9 = scmp.ne.s32.totalorder %s3467_s9, 0 }
  0x75   : > { %s3180_s17 = sand.u32 (!%p3473_p9), 1, %s2915_s25   ;;  %p3474_p0 = scmp.ne.s32.totalorder (!%p3473_p9), %s3464_s30, 0 }
  0x76   : > { %292 = sbr.rel (%p3473_p9) target bundleno = 951 (0x3b7), region = 48  ;;  %s2070_s23 = sshll.u32 (!%p3473_p9), %s3180_s17, 5 }
  0x77   : > { %s295_s11 = scalar_lea.sflag (!%p3473_p9), [#allocation3], %s3180_s17  ;;  %s3184_s20 = scalar_lea.vmem (!%p3473_p9), [#allocation2], %s2070_s23 }
  0x7d   : > { %2894 = dma.done.wait (%p3474_p0), %s295_s11, 512  }
  0x7e   : > { %2896 = vsyncadd (%p3474_p0), %s295_s11, 4294966784  ;;  %p3475_p11 = scmp.eq.s32.totalorder %s2996_s28, 0 }
  0x80   : > { %2898 = dma.done.wait (%p3475_p11), [#allocation6], 10240   ;;  %p3476_p8 = pmov %p3475_p11 }
  0x82   : > { %2900 = vsyncadd (%p3476_p8), [#allocation6], 4294957056  ;;  %p3477_p13 = pmov %p3476_p8 }
  0x83   : > { %p3478_p6 = pmov %p3476_p8 }
  0x84   : > { %2902 = dma.done.wait (%p3477_p13), [#allocation9], 1024  }
  0x85   : > { %2904 = vsyncadd (%p3478_p6), [#allocation9], 4294966272  ;;  %v2635_v0 = vld [vmem:[#allocation5] sm:$0xff]   ;;  %v2636_v1 = vld [vmem:[#allocation5 + $0x8] sm:$0xff]   ;;  %vm605_vm0 = vcmask 1040384   ;;  %vm640_vm2 = vcmask 1043456  }
  0x86   : > { %2393 = vmatprep.subr.bf16.mxu0 %v2635_v0  ;;  %v2637_v2 = vld [vmem:[#allocation5 + $0x10] sm:$0xff]   ;;  %v2638_v3 = vld [vmem:[#allocation5 + $0x18] sm:$0xff]   ;;  %v342_v4 = vld [vmem:[%s3184_s20] sm:$0xff]   ;;  %vm606_vm1 = vsmask.f32 256  ;;  %s2074_s8 = sshll.u32 %s3180_s17, 6 }
  0x87   : > { %2394 = vmatpush3.bf16.msra.mxu0 %v2635_v0  ;;  %v2647_v5 = vld [vmem:[#allocation7 + $0x100] sm:$0xff]   ;;  %2409 = vmatprep.mubr.bf16.mxu0 %v342_v4  ;;  %v2650_v8 = vld [vmem:[#allocation7 + $0x108] sm:$0xff]   ;;  %v2653_v11 = vld [vmem:[#allocation7 + $0x110] sm:$0xff]   ;;  %vm641_vm3 = vsmask.f32 3328  ;;  %s3389_s12 = scalar_lea.vmem [#allocation10], %s2074_s8 }
  0x88   : > { %2395 = vmatprep.subr.bf16.mxu0 %v2636_v1  ;;  %v2648_v6 = vld [vmem:[#allocation7 + $0xc0] sm:$0xff]   ;;  %2225 = vmatprep.subr.bf16.mxu1 %v2647_v5  ;;  %v2651_v9 = vld [vmem:[#allocation7 + $0xc8] sm:$0xff]   ;;  %v2654_v12 = vld [vmem:[#allocation7 + $0xd0] sm:$0xff]   ;;  %s1958_s21 = sshll.u32 %s3389_s12, 4  ;;  %s2212_s16 = sshll.u32 %s2996_s28, 10  ;;  %s3399_s21 = int_to_ptr.vmem [resolvable:$true] %s1958_s21 }
  0x89   : > { %v2639_v7 = vld [vmem:[#allocation5 + $0x20] sm:$0xff]   ;;  %2226 = vmatpush3.bf16.msra.mxu1 %v2648_v6  ;;  %v2640_v10 = vld [vmem:[#allocation5 + $0x28] sm:$0xff]   ;;  %v2656_v13 = vld [vmem:[#allocation7 + $0x118] sm:$0xff]   ;;  %s3405_s11 = scalar_lea.hbm %s3459_s7, %s2212_s16  ;;  %s1945_s28 = scalar_lea.sflag [#allocation4], %s3180_s17 }
  0x8a   : > { %2227 = vmatprep.subr.bf16.mxu1 %v2650_v8  ;;  %v2641_v14 = vld [vmem:[#allocation5 + $0x30] sm:$0xff]   ;;  %v2657_v15 = vld [vmem:[#allocation7 + $0xd8] sm:$0xff]   ;;  %v344_v17 = vld [vmem:[%s3184_s20 + $0x8] sm:$0xff]   ;;  %s2932_s30 = smov [#allocation10]  }
  0x8b   : > { %2396 = vmatpush3.bf16.msra.mxu0 %v2636_v1  ;;  %v2642_v16 = vld [vmem:[#allocation5 + $0x38] sm:$0xff]   ;;  %v346_v18 = vld [vmem:[%s3184_s20 + $0x10] sm:$0xff]   ;;  %v2649_v19 = vld [vmem:[#allocation7 + $0x140] sm:$0xff]   ;;  %v2931_v1 = vmov 0   ;;  %s2853_s9 = sshll.u32 %s2932_s30, 4  ;;  %s2854_s9 = int_to_ptr.vmem [resolvable:$false] %s2853_s9 }
  0x8c   : > { %2397 = vmatprep.subr.bf16.mxu0 %v2637_v2  ;;  %v2652_v20 = vld [vmem:[#allocation7 + $0x148] sm:$0xff]   ;;  %v348_v21 = vld [vmem:[%s3184_s20 + $0x18] sm:$0xff]   ;;  %v2655_v22 = vld [vmem:[#allocation7 + $0x150] sm:$0xff]   ;;  %s2855_s13 = scalar_lea.vmem %s2854_s9, 2048  ;;  %p2856_p12 = scmp.lt.s32.totalorder %s3399_s21, %s2854_s9 }
  0x8d   : > { %2228 = vmatpush3.bf16.msra.mxu1 %v2651_v9  ;;  %v2658_v23 = vld [vmem:[#allocation7 + $0x158] sm:$0xff]   ;;  %v2659_v24 = vld [vmem:[#allocation7 + $0x120] sm:$0xff]   ;;  %v2662_v27 = vld [vmem:[#allocation7 + $0x128] sm:$0xff]  }
  0x8e   : > { %2229 = vmatprep.subr.bf16.mxu1 %v2653_v11  ;;  %v2661_v25 = vld [vmem:[#allocation7 + $0x160] sm:$0xff]   ;;  %v2664_v28 = vld [vmem:[#allocation7 + $0x168] sm:$0xff]   ;;  %v2665_v30 = vld [vmem:[#allocation7 + $0x130] sm:$0xff]  }
  0x8f   : > { %2398 = vmatpush3.bf16.msra.mxu0 %v2637_v2  ;;  %v2660_v26 = vld [vmem:[#allocation7 + $0xe0] sm:$0xff]   ;;  %v2663_v29 = vld [vmem:[#allocation7 + $0xe8] sm:$0xff]   ;;  %v2667_v31 = vld [vmem:[#allocation7 + $0x170] sm:$0xff]   ;;  %v3222_v2 = vrot.slane %v2931_v1, 1 }
  0x90   : > { %2399 = vmatprep.subr.bf16.mxu0 %v2638_v3  ;;  %v2666_v32 = vld [vmem:[#allocation7 + $0xf0] sm:$0xff]   ;;  %v2668_v33 = vld [vmem:[#allocation7 + $0x138] sm:$0xff]   ;;  %v2671_v36 = vld [vmem:[#allocation7 + $0x40] sm:$0xff]  }
  0x91   : > { %2230 = vmatpush3.bf16.msra.mxu1 %v2654_v12  ;;  %v2670_v34 = vld [vmem:[#allocation7 + $0x178] sm:$0xff]   ;;  %v3202_v37 = vld [vmem:[#allocation7 + $0x80] sm:$0xff]   ;;  %vm3234_vm4 = vmand %vm605_vm0, %vm606_vm1 }
  0x92   : > { %2231 = vmatprep.subr.bf16.mxu1 %v2656_v13  ;;  %v2669_v35 = vld [vmem:[#allocation7 + $0xf8] sm:$0xff]   ;;  %v2075_v38 = vld [vmem:[%s3454_s2] ss:$0 sm:$0xff]  ;;  %vm3258_vm5 = vmand %vm640_vm2, %vm641_vm3 }
  0x93   : > { %2400 = vmatpush3.bf16.msra.mxu0 %v2638_v3 }
  0x94   : > { %2401 = vmatprep.subr.bf16.mxu0 %v2639_v7 }
  0x95   : > { %2232 = vmatpush3.bf16.msra.mxu1 %v2657_v15 }
  0x96   : > { %2233 = vmatprep.subr.bf16.mxu1 %v2659_v24 }
  0x97   : > { %2402 = vmatpush3.bf16.msra.mxu0 %v2639_v7 }
  0x98   : > { %2403 = vmatprep.subr.bf16.mxu0 %v2640_v10 }
  0x99   : > { %2234 = vmatpush3.bf16.msra.mxu1 %v2660_v26 }
  0x9a   : > { %2235 = vmatprep.subr.bf16.mxu1 %v2662_v27  ;;  %v2724_v27 = vld [vmem:[#allocation8 + $0x28] sm:$0xff]  }
  0x9b   : > { %2404 = vmatpush3.bf16.msra.mxu0 %v2640_v10 }
  0x9c   : > { %2405 = vmatprep.subr.bf16.mxu0 %v2641_v14 }
  0x9d   : > { %2236 = vmatpush3.bf16.msra.mxu1 %v2663_v29 }
  0x9e   : > { %2237 = vmatprep.subr.bf16.mxu1 %v2665_v30 }
  0x9f   : > { %2406 = vmatpush3.bf16.msra.mxu0 %v2641_v14 }
  0xa0   : > { %2407 = vmatprep.subr.bf16.mxu0 %v2642_v16 }
  0xa1   : > { %2238 = vmatpush3.bf16.msra.mxu1 %v2666_v32 }
  0xa2   : > { %2239 = vmatprep.subr.bf16.mxu1 %v2668_v33 }
  0xa3   : > { %2408 = vmatpush3.bf16.msra.mxu0 %v2642_v16 }
  0xa4   : > { %2417 = vmatprep.subr.bf16.mxu0 %v2649_v19 }
  0xa5   : > { %2240 = vmatpush3.bf16.msra.mxu1 %v2669_v35 }
  0xa6   : > { %2410 = vmatmul.mubr.bf16.vlgmr.msra.gmra.mrb[0].mxu0 %v344_v17  ;;  %2277 = vmatprep.subr.bf16.mxu1 %v2671_v36 }
  0xa7   : > { %2413 = vmatprep.mubr.bf16.mxu0 %v346_v18  ;;  %2418 = vmatpush3.bf16.msra.mxu0 %v2649_v19 }
  0xa8   : > { %2419 = vmatprep.subr.bf16.mxu0 %v2652_v20 }
  0xab   : > { %2420 = vmatpush3.bf16.msra.mxu0 %v2652_v20 }
  0xac   : > { %2421 = vmatprep.subr.bf16.mxu0 %v2655_v22 }
  0xae   : > { %2414 = vmatmul.mubr.bf16.gmra.mrb[4].mxu0 %v348_v21 }
  0xaf   : > { %2422 = vmatpush3.bf16.msra.mxu0 %v2655_v22 }
  0xb0   : > { %2423 = vmatprep.subr.bf16.mxu0 %v2658_v23 }
  0xb3   : > { %2424 = vmatpush3.bf16.msra.mxu0 %v2658_v23 }
  0xb4   : > { %2425 = vmatprep.subr.bf16.mxu0 %v2661_v25 }
  0xb7   : > { %2426 = vmatpush3.bf16.msra.mxu0 %v2661_v25 }
  0xb8   : > { %2427 = vmatprep.subr.bf16.mxu0 %v2664_v28 }
  0xbb   : > { %2428 = vmatpush3.bf16.msra.mxu0 %v2664_v28 }
  0xbc   : > { %2429 = vmatprep.subr.bf16.mxu0 %v2667_v31 }
  0xbf   : > { %2430 = vmatpush3.bf16.msra.mxu0 %v2667_v31 }
  0xc0   : > { %2431 = vmatprep.subr.bf16.mxu0 %v2670_v34 }
  0xc3   : > { %2432 = vmatpush3.bf16.msra.mxu0 %v2670_v34 }
  0xc4   : > { %2441 = vmatprep.subr.bf16.mxu0 %v3202_v37 }
 0x179   : > { %v2411_v39 = vpop.f32.mrb[0].mxu0 }
 0x17a   : > { %v488_v40 = vadd.f32 %v2411_v39, %v2075_v38  ;;  %v479_v41 = vpop.f32.mrb[1].mxu0 }
 0x17b   : > { %v480_v42 = vadd.f32 %v2075_v38, %v479_v41  ;;  %v2412_v43 = vpop.f32.mrb[2].mxu0 }
 0x17c   : > { %v512_v44 = vmax.f32 %v488_v40, 0.0  ;;  %v491_v45 = vadd.f32 %v2412_v43, %v2075_v38  ;;  %v482_v46 = vpop.f32.mrb[3].mxu0 }
 0x17d   : > { %v510_v47 = vmax.f32 %v480_v42, 0.0  ;;  %v483_v48 = vadd.f32 %v2075_v38, %v482_v46 }
 0x17e   : > { %v3208_v49 = vpack.c.bf16 %v512_v44, %v512_v44  ;;  %v513_v50 = vmax.f32 %v491_v45, 0.0 }
 0x17f   : > { %v2204_v51 = vpack.c.bf16 %v510_v47, %v510_v47  ;;  %v511_v52 = vmax.f32 %v483_v48, 0.0 }
 0x180   : > { %v563_v53 = vshrl.u32 %v3208_v49, 16  ;;  %v566_v54 = vshll.u32 %v3208_v49, 16  ;;  %v3212_v55 = vpack.c.bf16 %v513_v50, %v512_v44  ;;  %v3214_v56 = vpack.c.bf16 %v513_v50, %v513_v50 }
 0x181   : > { %v549_v57 = vshrl.u32 %v2204_v51, 16  ;;  %v552_v58 = vshll.u32 %v2204_v51, 16  ;;  %v3216_v59 = vpack.c.bf16 %v511_v52, %v510_v47  ;;  %v2205_v60 = vpack.c.bf16 %v511_v52, %v511_v52  ;;  %v2415_v61 = vpop.f32.mrb[4].mxu0 }
 0x182   : > { %v622_v62 = vrot.slane %v566_v54, 1  ;;  %v573_v63 = vshll.u32 %v3214_v56, 16  ;;  %v495_v0 = vpop.f32.mrb[5].mxu0  ;;  %v3224_v3 = vrot.slane %v563_v53, 7  ;;  %v570_v9 = vshrl.u32 %v3214_v56, 16 }
 0x183   : > { %v551_v4 = vrot.slane %v549_v57, 7  ;;  %v556_v5 = vshrl.u32 %v2205_v60, 16  ;;  %v559_v6 = vshll.u32 %v2205_v60, 16  ;;  %v2416_v7 = vpop.f32.mrb[6].mxu0  ;;  %999 = vmatprep.mubr.bf16.mxu1 %v3216_v59  ;;  %v618_v8 = vrot.slane %v552_v58, 1 }
 0x184   : > { %v624_v10 = vrot.slane %v573_v63, 1  ;;  %v504_v11 = vadd.f32 %v2415_v61, %v2075_v38  ;;  %v498_v12 = vpop.f32.mrb[7].mxu0  ;;  %v496_v15 = vadd.f32 %v2075_v38, %v495_v0  ;;  %v507_v16 = vadd.f32 %v2416_v7, %v2075_v38 }
 0x185   : > { %v558_v13 = vrot.slane %v556_v5, 7  ;;  %v620_v14 = vrot.slane %v559_v6, 1  ;;  %v623_v17 = vor.u32 %v622_v62, %v563_v53  ;;  %v499_v20 = vadd.f32 %v2075_v38, %v498_v12  ;;  %v2672_v53 = vld [vmem:[#allocation7] sm:$0xff]   ;;  %v2674_v62 = vld [vmem:[#allocation7 + $0x48] sm:$0xff]  }
 0x186   : > { %v625_v18 = vor.u32 %v624_v10, %v570_v9  ;;  %v516_v19 = vmax.f32 %v504_v11, 0.0  ;;  %v514_v21 = vmax.f32 %v496_v15, 0.0  ;;  %v517_v22 = vmax.f32 %v507_v16, 0.0  ;;  %v2675_v12 = vld [vmem:[#allocation7 + $0x8] sm:$0xff]  }
 0x187   : > { %v554_v23 = vor.u32 %v552_v58, %v551_v4  ;;  %v561_v24 = vor.u32 %v559_v6, %v558_v13  ;;  %v515_v26 = vmax.f32 %v499_v20, 0.0  ;;  %v619_v28 = vor.u32 %v618_v8, %v549_v57  ;;  %v2676_v13 = vld [vmem:[#allocation7 + $0x88] sm:$0xff]  }
 0x188   : > { %v3230_v25 = vpack.c.bf16 %v516_v19, %v516_v19  ;;  %v621_v29 = vor.u32 %v620_v14, %v556_v5  ;;  %v2208_v30 = vpack.c.bf16 %v514_v21, %v514_v21  ;;  %v3238_v31 = vpack.c.bf16 %v517_v22, %v516_v19 }
 0x189   : > { %v3240_v32 = vpack.c.bf16 %v517_v22, %v517_v22  ;;  %v3244_v33 = vsel %vm3234_vm4, 0, %v561_v24  ;;  %v3248_v36 = vpack.c.bf16 %v515_v26, %v514_v21  ;;  %v2209_v38 = vpack.c.bf16 %v515_v26, %v515_v26  ;;  %v2678_v26 = vld [vmem:[#allocation7 + $0x10] sm:$0xff]  }
 0x18a   : > { %v591_v34 = vshrl.u32 %v3230_v25, 16  ;;  %v594_v35 = vshll.u32 %v3230_v25, 16  ;;  %v577_v39 = vshrl.u32 %v2208_v30, 16  ;;  %v580_v40 = vshll.u32 %v2208_v30, 16 }
 0x18b   : > { %v735_v41 = vshrl.u32 %v3240_v32, 16  ;;  %v738_v42 = vshll.u32 %v3240_v32, 16  ;;  %v572_v43 = vrot.slane %v570_v9, 7  ;;  %v587_v45 = vshll.u32 %v2209_v38, 16 }
 0x18c   : > { %v593_v44 = vrot.slane %v591_v34, 7  ;;  %v3254_v46 = vsel %vm3234_vm4, 0, %v554_v23  ;;  %v630_v48 = vrot.slane %v594_v35, 1  ;;  %v579_v50 = vrot.slane %v577_v39, 7 }
 0x18d   : > { %v626_v51 = vrot.slane %v580_v40, 1  ;;  %v584_v52 = vshrl.u32 %v2209_v38, 16  ;;  %v737_v57 = vrot.slane %v735_v41, 7  ;;  %v743_v58 = vrot.slane %v738_v42, 1 }
 0x18e   : > { %v628_v60 = vrot.slane %v587_v45, 1  ;;  %v2096_v61 = vcombine.low %v3254_v46, %v3244_v33  ;;  %v3268_v0 = vsel %vm3258_vm5, %v619_v28, 0  ;;  %v645_v4 = vsel %vm3258_vm5, %v621_v29, 0  ;;  %v2679_v28 = vld [vmem:[#allocation7 + $0x90] sm:$0xff]  }
 0x18f   : > { %v646_v5 = vsel %vm3258_vm5, %v623_v17, 0  ;;  %v647_v6 = vsel %vm3258_vm5, %v625_v18, 0  ;;  %v2097_v7 = vcombine.low %v3268_v0, %v645_v4  ;;  %v568_v10 = vor.u32 %v566_v54, %v3224_v3  ;;  %v2677_v17 = vld [vmem:[#allocation7 + $0x50] sm:$0xff]  }
 0x190   : > { %1000 = vmatmul.mubr.bf16.vlgmr.msra.gmra.mrb[0].mxu1 %v2096_v61  ;;  %v2099_v8 = vcombine.low %v646_v5, %v647_v6  ;;  %v3277_v9 = vcombine.low %v645_v4, %v646_v5  ;;  %v586_v11 = vrot.slane %v584_v52, 7  ;;  %v575_v14 = vor.u32 %v573_v63, %v572_v43  ;;  %v2684_v5 = vld [vmem:[#allocation7 + $0x20] sm:$0xff]  }
 0x191   : > { %2278 = vmatpush3.bf16.msra.mxu1 %v2672_v53  ;;  %1007 = vmatprep.mubr.bf16.mxu1 %v3212_v55  ;;  %v627_v15 = vor.u32 %v626_v51, %v577_v39  ;;  %v629_v16 = vor.u32 %v628_v60, %v584_v52  ;;  %v611_v18 = vsel %vm3234_vm4, 0, %v568_v10  ;;  %v631_v19 = vor.u32 %v630_v48, %v591_v34  ;;  %v2680_v34 = vld [vmem:[#allocation7 + $0x58] sm:$0xff]   ;;  %v2683_v60 = vld [vmem:[#allocation7 + $0x60] sm:$0xff]   ;;  %v2690_v10 = vld [vmem:[#allocation7 + $0x30] sm:$0xff]  }
 0x192   : > { %2433 = vmatprep.mubr.bf16.mxu0 %v2097_v7  ;;  %2279 = vmatprep.subr.bf16.mxu1 %v2674_v62  ;;  %v744_v49 = vor.u32 %v743_v58, %v735_v41  ;;  %v527_v54 = vunpack.c.h.b16 %v3216_v59  ;;  %v612_v3 = vsel %vm3234_vm4, 0, %v575_v14  ;;  %v582_v20 = vor.u32 %v580_v40, %v579_v50  ;;  %v2681_v50 = vld [vmem:[#allocation7 + $0x18] sm:$0xff]   ;;  %v2688_v7 = vld [vmem:[#allocation7 + $0xa8] sm:$0xff]  }
 0x193   : > { %2434 = vmatmul.mubr.bf16.vlgmr.msra.gmra.mrb[8].mxu0 %v2099_v8  ;;  %v648_v56 = vsel %vm3258_vm5, %v627_v15, 0  ;;  %v649_v63 = vsel %vm3258_vm5, %v629_v16, 0  ;;  %v2098_v21 = vcombine.low %v611_v18, %v612_v3  ;;  %v650_v23 = vsel %vm3258_vm5, %v631_v19, 0  ;;  %v2682_v51 = vld [vmem:[#allocation7 + $0x98] sm:$0xff]   ;;  %v2689_v8 = vld [vmem:[#allocation7 + $0x70] sm:$0xff]   ;;  %v2696_v19 = vld [vmem:[#allocation7 + $0x180] sm:$0xff]  }
 0x194   : > { %2442 = vmatpush3.bf16.msra.mxu0 %v3202_v37  ;;  %v2101_v22 = vcombine.low %v648_v56, %v649_v63  ;;  %v3299_v24 = vsel %vm3258_vm5, %v744_v49, 0  ;;  %v643_v30 = vsel %vm3258_vm5, %v3222_v2, 0  ;;  %v589_v37 = vor.u32 %v587_v45, %v586_v11  ;;  %v2691_v11 = vld [vmem:[#allocation7 + $0xb0] sm:$0xff]   ;;  %v2693_v15 = vld [vmem:[#allocation7 + $0x38] sm:$0xff]   ;;  %v2697_v49 = vld [vmem:[#allocation7 + $0x200] sm:$0xff]  }
 0x195   : > { %2280 = vmatpush3.bf16.msra.mxu1 %v2675_v12  ;;  %2443 = vmatprep.subr.bf16.mxu0 %v2676_v13  ;;  %v2103_v29 = vcombine.low %v650_v23, %v3299_v24  ;;  %v596_v32 = vor.u32 %v594_v35, %v593_v44  ;;  %v613_v38 = vsel %vm3234_vm4, 0, %v582_v20  ;;  %v740_v39 = vor.u32 %v738_v42, %v737_v57  ;;  %v2692_v12 = vld [vmem:[#allocation7 + $0x78] sm:$0xff]   ;;  %v2703_v20 = vld [vmem:[#allocation7 + $0x210] sm:$0xff]  }
 0x196   : > { %2281 = vmatprep.subr.bf16.mxu1 %v2677_v17  ;;  %2437 = vmatprep.mubr.bf16.mxu0 %v2101_v22  ;;  %v528_v40 = vunpack.c.l.b16 %v3212_v55  ;;  %v3310_v41 = vcombine.low %v647_v6, %v648_v56  ;;  %v614_v43 = vsel %vm3234_vm4, 0, %v589_v37  ;;  %v3317_v25 = vcombine.low %v3244_v33, %v611_v18  ;;  %v2685_v6 = vld [vmem:[#allocation7 + $0xa0] sm:$0xff]   ;;  %v2694_v16 = vld [vmem:[#allocation7 + $0xb8] sm:$0xff]   ;;  %v2700_v56 = vld [vmem:[#allocation7 + $0x208] sm:$0xff]  }
 0x197   : > { %v615_v2 = vsel %vm3234_vm4, 0, %v596_v32  ;;  %v3319_v35 = vcombine.low %v649_v63, %v650_v23  ;;  %v2100_v44 = vcombine.low %v613_v38, %v614_v43  ;;  %v3323_v42 = vsel %vm3234_vm4, 0, %v740_v39  ;;  %v2695_v17 = vld [vmem:[#allocation7 + $0x1c0] sm:$0xff]   ;;  %v2701_v63 = vld [vmem:[#allocation7 + $0x1d0] sm:$0xff]   ;;  %v2705_v22 = vld [vmem:[#allocation7 + $0x198] sm:$0xff]  }
 0x198   : > { %2444 = vmatpush3.bf16.msra.mxu0 %v2676_v13  ;;  %1008 = vmatmul.mubr.bf16.gmra.mrb[4].mxu1 %v2098_v21  ;;  %v3325_v45 = vpack.c.b16 %v528_v40, %v527_v54  ;;  %v529_v48 = vunpack.c.h.b16 %v3212_v55  ;;  %v2102_v33 = vcombine.low %v615_v2, %v3323_v42  ;;  %v530_v52 = vunpack.c.l.b16 %v3248_v36  ;;  %v2704_v21 = vld [vmem:[#allocation7 + $0x1d8] sm:$0xff]   ;;  %v2711_v37 = vld [vmem:[#allocation7 + $0x1a8] sm:$0xff]  }
 0x199   : > { %2282 = vmatpush3.bf16.msra.mxu1 %v2678_v26  ;;  %2445 = vmatprep.subr.bf16.mxu0 %v2679_v28  ;;  %v3330_v53 = vcombine.low %v612_v3, %v613_v38  ;;  %v531_v57 = vunpack.c.h.b16 %v3248_v36  ;;  %v2130_v58 = vcombine.low %v643_v30, %v3268_v0  ;;  %v532_v55 = vunpack.c.l.b16 %v3238_v31  ;;  %v2687_v0 = vld [vmem:[#allocation7 + $0x28] sm:$0xff]   ;;  %v2706_v23 = vld [vmem:[#allocation7 + $0x218] sm:$0xff]   ;;  %v2707_v26 = vld [vmem:[#allocation7 + $0x1e0] sm:$0xff]  }
 0x19a   : > { %1015 = vmatprep.mubr.bf16.mxu1 %v3248_v36  ;;  %2283 = vmatprep.subr.bf16.mxu1 %v2680_v34  ;;  %v3336_v61 = vcombine.low %v614_v43, %v615_v2  ;;  %v3338_v62 = vpack.c.b16 %v530_v52, %v529_v48  ;;  %v2686_v36 = vld [vmem:[#allocation7 + $0x68] sm:$0xff]   ;;  %v544_v13 = vrot.slane %v2931_v1, 7  ;;  %v2129_v14 = vcombine.low %v2931_v1, %v3216_v59  ;;  %v2713_v34 = vld [vmem:[#allocation7 + $0x1f0] sm:$0xff]   ;;  %v2716_v39 = vld [vmem:[#allocation7 + $0x1f8] sm:$0xff]  }
 0x19b   : > { %2438 = vmatmul.mubr.bf16.gmra.mrb[12].mxu0 %v2103_v29  ;;  %v3340_v4 = vpack.c.b16 %v532_v55, %v531_v57  ;;  %v2698_v3 = vld [vmem:[#allocation7 + $0x1c8] sm:$0xff]   ;;  %v2709_v29 = vld [vmem:[#allocation7 + $0x220] sm:$0xff]   ;;  %v2715_v38 = vld [vmem:[#allocation7 + $0x230] sm:$0xff]   ;;  %v2161_v40 = vcombine.low %v2931_v1, %v2931_v1  ;;  %v669_v52 = vunpack.c.l.b16 %v2931_v1 }
 0x19c   : > { %2446 = vmatpush3.bf16.msra.mxu0 %v2679_v28  ;;  %2457 = vmatprep.mubr.bf16.mxu0 %v2130_v58  ;;  %v608_v18 = vsel %vm3234_vm4, 0, %v544_v13  ;;  %v2699_v59 = vld [vmem:[#allocation7 + $0x188] sm:$0xff]   ;;  %v2708_v28 = vld [vmem:[#allocation7 + $0x1a0] sm:$0xff]   ;;  %v2717_v43 = vld [vmem:[#allocation7 + $0x1b8] sm:$0xff]  }
 0x19d   : > { %2284 = vmatpush3.bf16.msra.mxu1 %v2681_v50  ;;  %2447 = vmatprep.subr.bf16.mxu0 %v2682_v51  ;;  %v2128_v54 = vcombine.low %v608_v18, %v3254_v46  ;;  %v2702_v46 = vld [vmem:[#allocation7 + $0x190] sm:$0xff]   ;;  %v2710_v30 = vld [vmem:[#allocation7 + $0x1e8] sm:$0xff]   ;;  %v2718_v2 = vld [vmem:[#allocation7 + $0x238] sm:$0xff]   ;;  %v1397_v50 = vshrl.u32 %v2161_v40, 16 }
 0x19e   : > { %2285 = vmatprep.subr.bf16.mxu1 %v2683_v60  ;;  %v2712_v32 = vld [vmem:[#allocation7 + $0x228] sm:$0xff]   ;;  %v2722_v1 = vld [vmem:[#allocation8 + $0x18] sm:$0xff]   ;;  %v2725_v55 = vld [vmem:[#allocation8 + $0x30] sm:$0xff]  }
 0x19f   : > { %v1399_v57 = vrot.slane %v1397_v50, 7 }
 0x1a0   : > { %2448 = vmatpush3.bf16.msra.mxu0 %v2682_v51  ;;  %1016 = vmatmul.mubr.bf16.gmra.mrb[8].mxu1 %v2100_v44  ;;  %v1400_v44 = vshll.u32 %v2161_v40, 16 }
 0x1a1   : > { %2286 = vmatpush3.bf16.msra.mxu1 %v2684_v5  ;;  %2449 = vmatprep.subr.bf16.mxu0 %v2685_v6 }
 0x1a2   : > { %1023 = vmatprep.mubr.bf16.mxu1 %v3238_v31  ;;  %2287 = vmatprep.subr.bf16.mxu1 %v2686_v36  ;;  %v1405_v48 = vrot.slane %v1400_v44, 1  ;;  %v1402_v60 = vor.u32 %v1400_v44, %v1399_v57 }
 0x1a4   : > { %2450 = vmatpush3.bf16.msra.mxu0 %v2685_v6  ;;  %v1406_v51 = vor.u32 %v1405_v48, %v1397_v50  ;;  %v1404_v47 = vsel %vm3234_vm4, 0, %v1402_v60 }
 0x1a5   : > { %2288 = vmatpush3.bf16.msra.mxu1 %v2687_v0  ;;  %2451 = vmatprep.subr.bf16.mxu0 %v2688_v7 }
 0x1a6   : > { %2289 = vmatprep.subr.bf16.mxu1 %v2689_v8 }
 0x1a8   : > { %2452 = vmatpush3.bf16.msra.mxu0 %v2688_v7  ;;  %1024 = vmatmul.mubr.bf16.gmra.mrb[12].mxu1 %v2102_v33 }
 0x1a9   : > { %2290 = vmatpush3.bf16.msra.mxu1 %v2690_v10  ;;  %2453 = vmatprep.subr.bf16.mxu0 %v2691_v11 }
 0x1aa   : > { %1297 = vmatprep.mubr.bf16.mxu1 %v2129_v14  ;;  %2291 = vmatprep.subr.bf16.mxu1 %v2692_v12 }
 0x1ac   : > { %2454 = vmatpush3.bf16.msra.mxu0 %v2691_v11 }
 0x1ad   : > { %2292 = vmatpush3.bf16.msra.mxu1 %v2693_v15  ;;  %2455 = vmatprep.subr.bf16.mxu0 %v2694_v16 }
 0x1ae   : > { %2329 = vmatprep.subr.bf16.mxu1 %v2695_v17 }
 0x1b0   : > { %2456 = vmatpush3.bf16.msra.mxu0 %v2694_v16  ;;  %1298 = vmatmul.mubr.bf16.vlgmr.msra.gmra.mrb[16].mxu1 %v2128_v54 }
 0x1b1   : > { %2330 = vmatpush3.bf16.msra.mxu1 %v2696_v19  ;;  %2465 = vmatprep.subr.bf16.mxu0 %v2697_v49 }
 0x1b2   : > { %1305 = vmatprep.mubr.bf16.mxu1 %v3325_v45  ;;  %2331 = vmatprep.subr.bf16.mxu1 %v2698_v3 }
 0x1b3   : > { %2458 = vmatmul.mubr.bf16.vlgmr.msra.gmra.mrb[8].mxu0 %v3277_v9 }
 0x1b4   : > { %2461 = vmatprep.mubr.bf16.mxu0 %v3310_v41  ;;  %2466 = vmatpush3.bf16.msra.mxu0 %v2697_v49 }
 0x1b5   : > { %2332 = vmatpush3.bf16.msra.mxu1 %v2699_v59  ;;  %2467 = vmatprep.subr.bf16.mxu0 %v2700_v56 }
 0x1b6   : > { %2333 = vmatprep.subr.bf16.mxu1 %v2701_v63 }
 0x1b8   : > { %2468 = vmatpush3.bf16.msra.mxu0 %v2700_v56  ;;  %1306 = vmatmul.mubr.bf16.gmra.mrb[20].mxu1 %v3317_v25 }
 0x1b9   : > { %2334 = vmatpush3.bf16.msra.mxu1 %v2702_v46  ;;  %2469 = vmatprep.subr.bf16.mxu0 %v2703_v20 }
 0x1ba   : > { %1313 = vmatprep.mubr.bf16.mxu1 %v3338_v62  ;;  %2335 = vmatprep.subr.bf16.mxu1 %v2704_v21 }
 0x1bb   : > { %2462 = vmatmul.mubr.bf16.gmra.mrb[12].mxu0 %v3319_v35 }
 0x1bc   : > { %2470 = vmatpush3.bf16.msra.mxu0 %v2703_v20  ;;  %2481 = vmatprep.mubr.bf16.mxu0 %v3277_v9  ;;  %v2714_v9 = vld [vmem:[#allocation7 + $0x1b0] sm:$0xff]  }
 0x1bd   : > { %2336 = vmatpush3.bf16.msra.mxu1 %v2705_v22  ;;  %2471 = vmatprep.subr.bf16.mxu0 %v2706_v23 }
 0x1be   : > { %2337 = vmatprep.subr.bf16.mxu1 %v2707_v26 }
 0x1c0   : > { %2472 = vmatpush3.bf16.msra.mxu0 %v2706_v23  ;;  %1314 = vmatmul.mubr.bf16.gmra.mrb[24].mxu1 %v3330_v53 }
 0x1c1   : > { %2338 = vmatpush3.bf16.msra.mxu1 %v2708_v28  ;;  %2473 = vmatprep.subr.bf16.mxu0 %v2709_v29 }
 0x1c2   : > { %1321 = vmatprep.mubr.bf16.mxu1 %v3340_v4  ;;  %2339 = vmatprep.subr.bf16.mxu1 %v2710_v30 }
 0x1c4   : > { %2474 = vmatpush3.bf16.msra.mxu0 %v2709_v29 }
 0x1c5   : > { %2340 = vmatpush3.bf16.msra.mxu1 %v2711_v37  ;;  %2475 = vmatprep.subr.bf16.mxu0 %v2712_v32 }
 0x1c6   : > { %2341 = vmatprep.subr.bf16.mxu1 %v2713_v34 }
 0x1c8   : > { %2476 = vmatpush3.bf16.msra.mxu0 %v2712_v32  ;;  %1322 = vmatmul.mubr.bf16.gmra.mrb[28].mxu1 %v3336_v61 }
 0x1c9   : > { %2342 = vmatpush3.bf16.msra.mxu1 %v2714_v9  ;;  %2477 = vmatprep.subr.bf16.mxu0 %v2715_v38 }
 0x1ca   : > { %1643 = vmatprep.mubr.bf16.mxu1 %v3325_v45  ;;  %2343 = vmatprep.subr.bf16.mxu1 %v2716_v39  ;;  %v1408_v45 = vsel %vm3258_vm5, %v1406_v51, 0 }
 0x1cb   : > { %v2163_v33 = vcombine.low %v3299_v24, %v1408_v45  ;;  %v2719_v24 = vld [vmem:[#allocation8] sm:$0xff]  }
 0x1cc   : > { %2478 = vmatpush3.bf16.msra.mxu0 %v2715_v38 }
 0x1cd   : > { %2344 = vmatpush3.bf16.msra.mxu1 %v2717_v43  ;;  %2479 = vmatprep.subr.bf16.mxu0 %v2718_v2 }
 0x1ce   : > { %2489 = vmatprep.subr.bf16.mxu1 %v2719_v24 }
 0x1d0   : > { %2480 = vmatpush3.bf16.msra.mxu0 %v2718_v2  ;;  %1644 = vmatmul.mubr.bf16.vlgmr.msra.gmra.mrb[32].mxu1 %v3317_v25  ;;  %v533_v25 = vunpack.c.h.b16 %v3238_v31  ;;  %v2721_v31 = vld [vmem:[#allocation8 + $0x10] sm:$0xff]  }
 0x1d1   : > { %1651 = vmatprep.mubr.bf16.mxu1 %v3338_v62  ;;  %2490 = vmatpush3.bf16.msra.mxu1 %v2719_v24 }
 0x1d2   : > { %v1462_v58 = vpack.c.b16 %v669_v52, %v533_v25 }
 0x1d3   : > { %2482 = vmatmul.mubr.bf16.vlgmr.msra.gmra.mrb[8].mxu0 %v3310_v41  ;;  %v2162_v41 = vcombine.low %v3323_v42, %v1404_v47  ;;  %v2726_v42 = vld [vmem:[#allocation8 + $0x38] sm:$0xff]  }
 0x1d4   : > { %2485 = vmatprep.mubr.bf16.mxu0 %v3319_v35  ;;  %v2720_v35 = vld [vmem:[#allocation8 + $0x8] sm:$0xff]  }
 0x1d5   : > { %2491 = vmatprep.subr.bf16.mxu1 %v2720_v35 }
 0x1d6   : > { %2492 = vmatpush3.bf16.msra.mxu1 %v2720_v35 }
 0x1d7   : > { %2493 = vmatprep.subr.bf16.mxu1 %v2721_v31 }
 0x1d8   : > { %1652 = vmatmul.mubr.bf16.gmra.mrb[36].mxu1 %v3330_v53  ;;  %v2723_v53 = vld [vmem:[#allocation8 + $0x20] sm:$0xff]  }
 0x1d9   : > { %1659 = vmatprep.mubr.bf16.mxu1 %v3340_v4 }
 0x1da   : > { %2494 = vmatpush3.bf16.msra.mxu1 %v2721_v31 }
 0x1db   : > { %2486 = vmatmul.mubr.bf16.gmra.mrb[12].mxu0 %v2163_v33  ;;  %2495 = vmatprep.subr.bf16.mxu1 %v2722_v1 }
 0x1de   : > { %2496 = vmatpush3.bf16.msra.mxu1 %v2722_v1 }
 0x1df   : > { %2497 = vmatprep.subr.bf16.mxu1 %v2723_v53 }
 0x1e0   : > { %1660 = vmatmul.mubr.bf16.gmra.mrb[40].mxu1 %v3336_v61 }
 0x1e1   : > { %1667 = vmatprep.mubr.bf16.mxu1 %v1462_v58 }
 0x1e2   : > { %2498 = vmatpush3.bf16.msra.mxu1 %v2723_v53 }
 0x1e3   : > { %2499 = vmatprep.subr.bf16.mxu1 %v2724_v27 }
 0x1e6   : > { %2500 = vmatpush3.bf16.msra.mxu1 %v2724_v27 }
 0x1e7   : > { %2501 = vmatprep.subr.bf16.mxu1 %v2725_v55 }
 0x1e8   : > { %1668 = vmatmul.mubr.bf16.gmra.mrb[44].mxu1 %v2162_v41 }
 0x1ea   : > { %2502 = vmatpush3.bf16.msra.mxu1 %v2725_v55 }
 0x1eb   : > { %2503 = vmatprep.subr.bf16.mxu1 %v2726_v42 }
 0x1ee   : > { %2504 = vmatpush3.bf16.msra.mxu1 %v2726_v42 }
 0x263   : > { %v2241_v61 = vpop.f32.mrb[0].mxu1 }
 0x264   : > { %v2242_v62 = vpop.f32.mrb[1].mxu1 }
 0x265   : > { %v2243_v4 = vadd.f32 %v2242_v62, %v2241_v61  ;;  %v2244_v5 = vpop.f32.mrb[2].mxu1  ;;  %v2188_v62 = vld [vmem:[%s3456_s4] ss:$0 sm:$0xff] }
 0x266   : > { %v2245_v6 = vpop.f32.mrb[3].mxu1 }
 0x267   : > { %v2246_v36 = vadd.f32 %v2245_v6, %v2244_v5 }
 0x26b   : > { %v2247_v0 = vpop.f32.mrb[4].mxu1 }
 0x26c   : > { %v2248_v7 = vpop.f32.mrb[5].mxu1 }
 0x26d   : > { %v2249_v8 = vadd.f32 %v2248_v7, %v2247_v0  ;;  %v2250_v10 = vpop.f32.mrb[6].mxu1 }
 0x26e   : > { %v2251_v11 = vpop.f32.mrb[7].mxu1 }
 0x26f   : > { %v2252_v12 = vadd.f32 %v2251_v11, %v2250_v10 }
 0x273   : > { %v2253_v13 = vpop.f32.mrb[8].mxu1 }
 0x274   : > { %v2254_v14 = vpop.f32.mrb[9].mxu1 }
 0x275   : > { %v2255_v15 = vadd.f32 %v2254_v14, %v2253_v13  ;;  %v2256_v16 = vpop.f32.mrb[10].mxu1 }
 0x276   : > { %v2257_v17 = vpop.f32.mrb[11].mxu1 }
 0x277   : > { %v2258_v18 = vadd.f32 %v2257_v17, %v2256_v16 }
 0x27b   : > { %v2259_v19 = vpop.f32.mrb[12].mxu1 }
 0x27c   : > { %v2260_v49 = vpop.f32.mrb[13].mxu1 }
 0x27d   : > { %v2261_v54 = vadd.f32 %v2260_v49, %v2259_v19  ;;  %v2262_v3 = vpop.f32.mrb[14].mxu1 }
 0x27e   : > { %v2263_v59 = vpop.f32.mrb[15].mxu1 }
 0x27f   : > { %v2264_v56 = vadd.f32 %v2263_v59, %v2262_v3 }
 0x283   : > { %v2293_v63 = vpop.f32.mrb[16].mxu1 }
 0x284   : > { %v2294_v46 = vpop.f32.mrb[17].mxu1 }
 0x285   : > { %v2295_v20 = vadd.f32 %v2294_v46, %v2293_v63  ;;  %v2296_v21 = vpop.f32.mrb[18].mxu1 }
 0x286   : > { %v2297_v22 = vpop.f32.mrb[19].mxu1 }
 0x287   : > { %v2516_v23 = vadd.f32 %v2295_v20, %v2243_v4  ;;  %v2298_v26 = vadd.f32 %v2297_v22, %v2296_v21 }
 0x289   : > { %v2522_v28 = vadd.f32 %v2298_v26, %v2246_v36 }
 0x28b   : > { %v2299_v29 = vpop.f32.mrb[20].mxu1 }
 0x28c   : > { %v2300_v30 = vpop.f32.mrb[21].mxu1 }
 0x28d   : > { %v2301_v37 = vadd.f32 %v2300_v30, %v2299_v29  ;;  %v2302_v32 = vpop.f32.mrb[22].mxu1 }
 0x28e   : > { %v2303_v34 = vpop.f32.mrb[23].mxu1 }
 0x28f   : > { %v2513_v9 = vadd.f32 %v2301_v37, %v2249_v8  ;;  %v2304_v38 = vadd.f32 %v2303_v34, %v2302_v32 }
 0x291   : > { %v2519_v39 = vadd.f32 %v2304_v38, %v2252_v12 }
 0x293   : > { %v2305_v40 = vpop.f32.mrb[24].mxu1 }
 0x294   : > { %v2306_v43 = vpop.f32.mrb[25].mxu1 }
 0x295   : > { %v2307_v2 = vadd.f32 %v2306_v43, %v2305_v40  ;;  %v2308_v44 = vpop.f32.mrb[26].mxu1 }
 0x296   : > { %v2309_v48 = vpop.f32.mrb[27].mxu1 }
 0x297   : > { %v2528_v50 = vadd.f32 %v2307_v2, %v2255_v15  ;;  %v2310_v51 = vadd.f32 %v2309_v48, %v2308_v44 }
 0x299   : > { %v2534_v45 = vadd.f32 %v2310_v51, %v2258_v18 }
 0x29b   : > { %v2311_v33 = vpop.f32.mrb[28].mxu1 }
 0x29c   : > { %v2312_v25 = vpop.f32.mrb[29].mxu1 }
 0x29d   : > { %v2313_v52 = vadd.f32 %v2312_v25, %v2311_v33  ;;  %v2314_v57 = vpop.f32.mrb[30].mxu1 }
 0x29e   : > { %v2315_v58 = vpop.f32.mrb[31].mxu1 }
 0x29f   : > { %v2525_v60 = vadd.f32 %v2313_v52, %v2261_v54  ;;  %v2316_v47 = vadd.f32 %v2315_v58, %v2314_v57 }
 0x2a1   : > { %v3377_v41 = vadd.f32 %v2316_v47, %v2264_v56 }
 0x2a3   : > { %v2345_v24 = vpop.f32.mrb[32].mxu1 }
 0x2a4   : > { %v2346_v35 = vpop.f32.mrb[33].mxu1 }
 0x2a5   : > { %v2347_v31 = vadd.f32 %v2346_v35, %v2345_v24  ;;  %v2348_v1 = vpop.f32.mrb[34].mxu1 }
 0x2a6   : > { %v2483_v53 = vpop.f32.mrb[8].mxu0  ;;  %v2349_v27 = vpop.f32.mrb[35].mxu1 }
 0x2a7   : > { %v1710_v55 = vpop.f32.mrb[9].mxu0  ;;  %v2517_v42 = vadd.f32 %v2516_v23, %v2347_v31  ;;  %v2350_v61 = vadd.f32 %v2349_v27, %v2348_v1 }
 0x2a8   : > { %v2484_v4 = vpop.f32.mrb[10].mxu0 }
 0x2a9   : > { %v2518_v5 = vadd.f32 %v2517_v42, %v1710_v55  ;;  %v1713_v6 = vpop.f32.mrb[11].mxu0  ;;  %v2523_v36 = vadd.f32 %v2522_v28, %v2350_v61  ;;  %v2731_v42 = vld [vmem:[%s3184_s20 + $0x8] sm:$0xff]  }
 0x2aa   : > { %v1914_v61 = vunpack.c.l.bf16 %v2731_v42 }
 0x2ab   : > { %v1756_v0 = vadd.f32 %v2518_v5, %v2188_v62  ;;  %v2524_v7 = vadd.f32 %v2523_v36, %v1713_v6  ;;  %v2351_v8 = vpop.f32.mrb[36].mxu1 }
 0x2ac   : > { %v2352_v10 = vpop.f32.mrb[37].mxu1 }
 0x2ad   : > { %v1757_v11 = vadd.f32 %v2524_v7, %v2188_v62  ;;  %v2353_v12 = vadd.f32 %v2352_v10, %v2351_v8  ;;  %v2354_v13 = vpop.f32.mrb[38].mxu1  ;;  %v1764_v16 = vmax.f32 %v1756_v0, 0.0  ;;  %v1915_v0 = vunpack.c.h.bf16 %v2731_v42 }
 0x2ae   : > { %v2487_v14 = vpop.f32.mrb[12].mxu0  ;;  %v2355_v15 = vpop.f32.mrb[39].mxu1 }
 0x2af   : > { %v1765_v17 = vmax.f32 %v1757_v11, 0.0  ;;  %v2514_v18 = vadd.f32 %v2513_v9, %v2353_v12  ;;  %v1726_v19 = vpop.f32.mrb[13].mxu0  ;;  %v2356_v49 = vadd.f32 %v2355_v15, %v2354_v13 }
 0x2b0   : > { %v2488_v54 = vpop.f32.mrb[14].mxu0 }
 0x2b1   : > { %v2515_v3 = vadd.f32 %v2514_v18, %v2483_v53  ;;  %v2520_v59 = vadd.f32 %v2519_v39, %v2356_v49  ;;  %v1729_v56 = vpop.f32.mrb[15].mxu0  ;;  %v1772_v63 = vpack.c.bf16 %v1765_v17, %v1764_v16 }
 0x2b3   : > { %v1758_v46 = vadd.f32 %v2515_v3, %v2188_v62  ;;  %v2521_v20 = vadd.f32 %v2520_v59, %v2484_v4  ;;  %v2357_v21 = vpop.f32.mrb[40].mxu1  ;;  %2505 = vmatprep.mubr.bf16.mxu1 %v1772_v63  ;;  %v2732_v4 = vld [vmem:[%s3184_s20] sm:$0xff]  }
 0x2b4   : > { %v2358_v22 = vpop.f32.mrb[41].mxu1  ;;  %v1912_v5 = vunpack.c.l.bf16 %v2732_v4  ;;  %v1913_v7 = vunpack.c.h.bf16 %v2732_v4 }
 0x2b5   : > { %v1759_v23 = vadd.f32 %v2521_v20, %v2188_v62  ;;  %v2359_v26 = vadd.f32 %v2358_v22, %v2357_v21  ;;  %v2360_v28 = vpop.f32.mrb[42].mxu1  ;;  %v1766_v30 = vmax.f32 %v1758_v46, 0.0 }
 0x2b6   : > { %v2361_v29 = vpop.f32.mrb[43].mxu1 }
 0x2b7   : > { %v1767_v37 = vmax.f32 %v1759_v23, 0.0  ;;  %v2529_v32 = vadd.f32 %v2528_v50, %v2359_v26  ;;  %v2362_v34 = vadd.f32 %v2361_v29, %v2360_v28 }
 0x2b9   : > { %v1773_v9 = vpack.c.bf16 %v1767_v37, %v1766_v30  ;;  %v2530_v38 = vadd.f32 %v2529_v32, %v1726_v19  ;;  %v2535_v40 = vadd.f32 %v2534_v45, %v2362_v34 }
 0x2bb   : > { %v2536_v43 = vadd.f32 %v2535_v40, %v1729_v56  ;;  %v2363_v39 = vpop.f32.mrb[44].mxu1  ;;  %2506 = vmatmul.mubr.bf16.vlgmr.msra.gmra.mrb[48].mxu1 %v1773_v9  ;;  %v1760_v2 = vadd.f32 %v2530_v38, %v2188_v62  ;;  %v2734_v56 = vld [vmem:[%s3184_s20 + $0x10] sm:$0xff]  }
 0x2bc   : > { %v2364_v44 = vpop.f32.mrb[45].mxu1  ;;  %v1916_v63 = vunpack.c.l.bf16 %v2734_v56  ;;  %v1917_v26 = vunpack.c.h.bf16 %v2734_v56 }
 0x2bd   : > { %v2365_v48 = vadd.f32 %v2364_v44, %v2363_v39  ;;  %v2366_v51 = vpop.f32.mrb[46].mxu1  ;;  %v1761_v33 = vadd.f32 %v2536_v43, %v2188_v62  ;;  %v1768_v58 = vmax.f32 %v1760_v2, 0.0 }
 0x2be   : > { %v2367_v25 = vpop.f32.mrb[47].mxu1 }
 0x2bf   : > { %v2526_v52 = vadd.f32 %v2525_v60, %v2365_v48  ;;  %v2368_v57 = vadd.f32 %v2367_v25, %v2366_v51  ;;  %v1769_v47 = vmax.f32 %v1761_v33, 0.0  ;;  %v2189_v60 = vld [vmem:[%s3458_s6] ss:$0 sm:$0xff] }
 0x2c1   : > { %v2527_v50 = vadd.f32 %v2526_v52, %v2487_v14  ;;  %v2532_v24 = vadd.f32 %v3377_v41, %v2368_v57  ;;  %v1774_v45 = vpack.c.bf16 %v1769_v47, %v1768_v58 }
 0x2c3   : > { %v2533_v35 = vadd.f32 %v2532_v24, %v2488_v54  ;;  %2509 = vmatprep.mubr.bf16.mxu1 %v1774_v45  ;;  %v1762_v31 = vadd.f32 %v2527_v50, %v2188_v62  ;;  %v2733_v54 = vld [vmem:[%s3184_s20 + $0x18] sm:$0xff]   ;;  %s2849_s20 = scalar_lea.vmem %s3399_s21, 1024 }
 0x2c4   : > { %v1918_v3 = vunpack.c.l.bf16 %v2733_v54  ;;  %v1919_v21 = vunpack.c.h.bf16 %v2733_v54  ;;  %p2850_p10 = scmp.ne.s32.totalorder %s3399_s21, %s2849_s20  ;;  %p2857_p1 = scmp.lt.s32.totalorder %s2855_s13, %s2849_s20 }
 0x2c5   : > { %v1763_v1 = vadd.f32 %v2533_v35, %v2188_v62  ;;  %v1770_v53 = vmax.f32 %v1762_v31, 0.0 }
 0x2c6   : > { %p2851_p3 = pnand %p2850_p10, %p3129_p5  ;;  %p2858_p2 = por %p2857_p1, %p2856_p12 }
 0x2c7   : > { %v1771_v27 = vmax.f32 %v1763_v1, 0.0 }
 0x2c8   : > { %p2852_p7 = pneg %p2851_p3 }
 0x2c9   : > { %v1775_v55 = vpack.c.bf16 %v1771_v27, %v1770_v53 }
 0x2ca   : > { %p2859_p4 = pnand %p2858_p2, %p2852_p7 }
 0x2cb   : > { %2510 = vmatmul.mubr.bf16.gmra.mrb[52].mxu1 %v1775_v55 }
 0x38e   : > { %v2507_v6 = vpop.f32.mrb[48].mxu1 }
 0x38f   : > { %v1890_v41 = vadd.f32 %v2507_v6, %v2189_v60  ;;  %v1881_v36 = vpop.f32.mrb[49].mxu1 }
 0x390   : > { %v1882_v8 = vadd.f32 %v2189_v60, %v1881_v36  ;;  %v2508_v62 = vpop.f32.mrb[50].mxu1 }
 0x391   : > { %v1922_v10 = vadd.f32 %v1914_v61, %v1890_v41  ;;  %v1893_v11 = vadd.f32 %v2508_v62, %v2189_v60  ;;  %v1884_v12 = vpop.f32.mrb[51].mxu1 }
 0x392   : > { %v1920_v13 = vadd.f32 %v1912_v5, %v1882_v8  ;;  %v1885_v14 = vadd.f32 %v2189_v60, %v1884_v12 }
 0x393   : > { %v1930_v15 = vmax.f32 %v1922_v10, 0.0  ;;  %v1923_v16 = vadd.f32 %v1915_v0, %v1893_v11 }
 0x394   : > { %v1928_v17 = vmax.f32 %v1920_v13, 0.0  ;;  %v1921_v18 = vadd.f32 %v1913_v7, %v1885_v14 }
 0x395   : > { %1938 = vst [vmem:[%s3389_s12 + $0x10] sm:$0xff] %v1930_v15  ;;  %v1931_v19 = vmax.f32 %v1923_v16, 0.0 }
 0x396   : > { %1936 = vst [vmem:[%s3389_s12] sm:$0xff] %v1928_v17  ;;  %v1929_v49 = vmax.f32 %v1921_v18, 0.0 }
 0x397   : > { %1939 = vst [vmem:[%s3389_s12 + $0x18] sm:$0xff] %v1931_v19 }
 0x398   : > { %1937 = vst [vmem:[%s3389_s12 + $0x8] sm:$0xff] %v1929_v49 }
 0x39e   : > { %v2511_v59 = vpop.f32.mrb[52].mxu1 }
 0x39f   : > { %v1906_v46 = vadd.f32 %v2511_v59, %v2189_v60  ;;  %v1897_v20 = vpop.f32.mrb[53].mxu1 }
 0x3a0   : > { %v1898_v22 = vadd.f32 %v2189_v60, %v1897_v20  ;;  %v2512_v23 = vpop.f32.mrb[54].mxu1 }
 0x3a1   : > { %v1926_v28 = vadd.f32 %v1918_v3, %v1906_v46  ;;  %v1909_v29 = vadd.f32 %v2512_v23, %v2189_v60  ;;  %v1900_v30 = vpop.f32.mrb[55].mxu1 }
 0x3a2   : > { %v1924_v37 = vadd.f32 %v1916_v63, %v1898_v22  ;;  %v1901_v32 = vadd.f32 %v2189_v60, %v1900_v30 }
 0x3a3   : > { %v1934_v34 = vmax.f32 %v1926_v28, 0.0  ;;  %v1927_v9 = vadd.f32 %v1919_v21, %v1909_v29 }
 0x3a4   : > { %v1932_v38 = vmax.f32 %v1924_v37, 0.0  ;;  %v1925_v40 = vadd.f32 %v1917_v26, %v1901_v32 }
 0x3a5   : > { %1942 = vst [vmem:[%s3389_s12 + $0x30] sm:$0xff] %v1934_v34  ;;  %v1935_v43 = vmax.f32 %v1927_v9, 0.0 }
 0x3a6   : > { %1940 = vst [vmem:[%s3389_s12 + $0x20] sm:$0xff] %v1932_v38  ;;  %v1933_v39 = vmax.f32 %v1925_v40, 0.0 }
 0x3a7   : > { %1943 = vst [vmem:[%s3389_s12 + $0x38] sm:$0xff] %v1935_v43 }
 0x3a8   : > { %1941 = vst [vmem:[%s3389_s12 + $0x28] sm:$0xff] %v1933_v39 }
 0x3a9   : > { %2862 = shalt.err (!%p2859_p4)
}
 0x3aa   : > { %s2863_s15 = scalar_lea.hbm %s3405_s11, 1024  ;;  %s2867_s8 = scalar_lea.hbm %s3459_s7, 2048 }
 0x3ab   : > { %p2864_p9 = scmp.ne.s32.totalorder %s3405_s11, %s2863_s15  ;;  %p2868_p8 = scmp.lt.u32.totalorder %s3405_s11, %s3459_s7 }
 0x3ac   : > { %p2869_p13 = scmp.lt.u32.totalorder %s2867_s8, %s2863_s15  ;;  %p2871_p10 = scmp.lt.u32.totalorder %s2863_s15, %s3405_s11 }
 0x3ad   : > { %p2865_p0 = pnand %p2864_p9, %p3129_p5 }
 0x3ae   : > { %p2870_p6 = por %p2869_p13, %p2868_p8 }
 0x3af   : > { %p2866_p11 = pneg %p2865_p0 }
 0x3b0   : > { %p2872_p3 = por %p2871_p10, %p2870_p6 }
 0x3b2   : > { %p2873_p7 = pnand %p2872_p3, %p2866_p11 }
 0x3b4   : > { %2876 = shalt.err (!%p2873_p7)
}
 0x3b5   : > { %s2933_s29 = smov 128   ;;  %s2934_s23 = smov 8  }
 0x3b6   : > { %2567 = dma.vmem_to_hbm [thread:$0]  (%p3129_p5), %s3399_s21, 1024, %s3405_s11, %s1945_s28, %s2933_s29, %s2933_s29, %s2934_s23  }
 0x3b7 PF: > { %s3483_s20 = sld [smem:[#allocation15_spill]]  ;;  %s1973_s30 = sand.u32 1, %s2911_s24  }
 0x3b8   : > { %p3485_p1 = scmp.ge.s32.totalorder %s2923_s27, 2  ;;  %s1974_s9 = scalar_lea.sflag [#allocation4], %s1973_s30 }
 0x3bd   : > { %p3484_p12 = scmp.ne.s32.totalorder %s3483_s20, 0 }
 0x3bf   : > { %p2584_p2 = pnand %p3485_p1, %p3484_p12 }
 0x3c1   : > { %2906 = dma.done.wait (!%p2584_p2), %s1974_s9, 1024  }
 0x3c2   : > { %2908 = vsyncadd (!%p2584_p2), %s1974_s9, 4294966272  ;;  %p22_p4 = scmp.ge.s32.totalorder %s3115_s22, 4   ;;  %s3486_s24 = smov %s2915_s25 }
 0x3c3   : > { %s3487_s25 = smov %s2919_s26  ;;  %s3488_s26 = smov %s3125_s18 }
 0x3c4   : > { %s3489_s27 = smov %s3115_s22  ;;  %24 = sbr.rel (!%p22_p4) target bundleno = 7 (0x7), region = 105 }
 0x3cb   :  { %1979 = vsyncpa [#allocation3], 1 }
 0x3cc   :  { %1981 = vsyncpa [#allocation3 + $0x1], 1 }
 0x3cd   :  { %1982 = vsyncpa [#allocation6], 1 }
 0x3ce   :  { %1983 = vsyncpa [#allocation9], 1 }
 0x3cf   :  { %1984 = vsyncpa [#allocation4], 1 }
 0x3d0   :  { %1986 = vsyncpa [#allocation4 + $0x1], 1 }

</bundles_post_ra>
